<compile_context>
chip_gen: v5e
topology: v5e:2x2
jax: 0.10.0
libtpu: 0.0.40
codegen_flags: <defaults>
</compile_context>

<pallas_src>
import math
import functools

import jax
import jax.numpy as jnp
from jax import lax
from jax.experimental import pallas as pl
from jax.experimental.pallas import tpu as pltpu


def mhsa_kernel(x_ref, mask_ref, wqkv_ref, bqkv_ref, wo_ref, bo_ref, out_ref,
                qkv_ref, acc_ref, *, num_heads, d_k, q_tile):
    """Grid = (B, L // q_tile). Ref shapes:
         x_ref    (L, C)    whole sequence for this batch element (VMEM-resident
                            across query tiles: constant block index over qi)
         mask_ref (TQ, L)   int8 mask tile (1 = attend, 0 = masked)
         wqkv_ref (C, 3C)   fused QKV weights (1/sqrt(d_k) folded into Q part)
         bqkv_ref (1, 3C)   fused QKV bias (f32)
         wo_ref   (C, C)    output projection weights ("x @ W" layout)
         bo_ref   (1, C)    output projection bias (f32)
         out_ref  (TQ, C)   output tile
         qkv_ref  (L, 3C)   VMEM scratch: QKV activations, computed once per b
         acc_ref  (TQ, C)   VMEM scratch: f32 output-projection accumulator
    """
    C = num_heads * d_k
    qi = pl.program_id(1)

    # One full-width (L, C) x (C, 3C) MXU matmul per batch element; later query
    # tiles of the same batch element reuse the scratch (qi axis is "arbitrary",
    # so iteration order within a batch element is fixed).
    @pl.when(qi == 0)
    def _():
        qkv = jnp.dot(x_ref[...], wqkv_ref[...],
                      preferred_element_type=jnp.float32)
        # Add bias and cast to the compute dtype ONCE (halves the slab for bf16).
        qkv_ref[...] = (qkv + bqkv_ref[...]).astype(qkv_ref.dtype)

    cdtype = qkv_ref.dtype

    # Additive mask bias generated in-kernel from the int8 mask tile
    # (no (B, L, L) f32 bias shipped from HBM).
    m = mask_ref[...].astype(jnp.float32)                      # (TQ, L)
    bias = jnp.where(m == 0.0, jnp.float32(-1e9), jnp.float32(0.0))

    row0 = pl.multiple_of(qi * q_tile, q_tile)
    q_slab = qkv_ref[pl.ds(row0, q_tile), 0:C]                 # (TQ, C), one dyn-row load

    for h in range(num_heads):
        lo = h * d_k
        q_h = q_slab[:, lo:lo + d_k]                           # (TQ, d_k), scale pre-folded
        k_h = qkv_ref[:, C + lo:C + lo + d_k]                  # (L, d_k)
        v_h = qkv_ref[:, 2 * C + lo:2 * C + lo + d_k]          # (L, d_k)

        # scores = q k^T : contract trailing d_k dims directly (no explicit k.T).
        s = lax.dot_general(q_h, k_h, (((1,), (1,)), ((), ())),
                            preferred_element_type=jnp.float32)   # (TQ, L)
        s = s + bias
        # Softmax in f32; exact reciprocal keeps the 1e-4 allclose vs. reference.
        s = s - jnp.max(s, axis=-1, keepdims=True)
        p = jnp.exp(s)
        p = p * pl.reciprocal(jnp.sum(p, axis=-1, keepdims=True), approx=False)
        # TODO(synk): attention dropout omitted (eval / inference, p_drop = 0).

        pv = jnp.dot(p.astype(cdtype), v_h,
                     preferred_element_type=jnp.float32)          # (TQ, d_k)
        # Feed each head straight into its slice of W_out: no (TQ, C) concat,
        # no sub-128-lane masked stores; accumulation is MRB-friendly on v7x.
        contrib = jnp.dot(pv.astype(cdtype), wo_ref[lo:lo + d_k, :],
                          preferred_element_type=jnp.float32)     # (TQ, C)
        if h == 0:
            acc_ref[...] = contrib
        else:
            acc_ref[...] += contrib

    out_ref[...] = (acc_ref[...] + bo_ref[...]).astype(out_ref.dtype)
    # TODO(synk): for very long L, also tile the key dim with a flash-style
    # online softmax so live scores are (TQ, TK) instead of (TQ, L).


def _choose_q_tile(L):
    for t in (256, 128):
        if L > t and L % t == 0:
            return t
    return L


def mhsa_forward(x, mask, params, num_heads):
    """Pallas MHSA forward. params are PyTorch-layout (W: (out,in), b: (out,))."""
    B, L, C = x.shape
    H = num_heads
    d_k = C // H
    wq, bq, wk, bk, wv, bv, wo, bo = params
    scale = 1.0 / math.sqrt(d_k)
    cdtype = x.dtype

    # Plain-JAX glue (off the hot path):
    #  - fold the 1/sqrt(d_k) attention scale into the Q projection,
    #  - fuse Q/K/V into one (C, 3C) weight slab + (1, 3C) bias,
    #  - transpose the output projection into (C, C) "x @ W" layout,
    #  - ship the mask as int8 (1 = attend, 0 = masked).
    wqkv = jnp.concatenate([wq.T * scale, wk.T, wv.T], axis=1).astype(cdtype)   # (C, 3C)
    bqkv = jnp.concatenate([bq * scale, bk, bv]).reshape(1, 3 * C).astype(jnp.float32)
    wo_t = wo.T.astype(cdtype)                                                  # (C, C)
    bo_r = bo.reshape(1, C).astype(jnp.float32)
    mask_i8 = (mask != 0).astype(jnp.int8)                                      # (B, L, L)

    TQ = _choose_q_tile(L)
    nq = L // TQ
    itemsize = jnp.dtype(cdtype).itemsize

    per_b   = lambda b, qi: (b, 0, 0)   # x: whole sequence, resident across query tiles
    q_tiled = lambda b, qi: (b, qi, 0)
    const2d = lambda b, qi: (0, 0)      # weights: fetched once, VMEM-resident

    def build(single_buffer_weights):
        pm = dict(pipeline_mode=pl.Buffered(1)) if single_buffer_weights else {}
        grid_spec = pltpu.PrefetchScalarGridSpec(
            num_scalar_prefetch=0,
            grid=(B, nq),
            in_specs=[
                pl.BlockSpec((pl.Squeezed(), L, C), per_b),      # x
                pl.BlockSpec((pl.Squeezed(), TQ, L), q_tiled),   # int8 mask tile
                pl.BlockSpec((C, 3 * C), const2d, **pm),         # fused QKV weights
                pl.BlockSpec((1, 3 * C), const2d, **pm),         # fused QKV bias
                pl.BlockSpec((C, C), const2d, **pm),             # out-proj weights
                pl.BlockSpec((1, C), const2d, **pm),             # out-proj bias
            ],
            out_specs=pl.BlockSpec((pl.Squeezed(), TQ, C), q_tiled),
            scratch_shapes=[
                pltpu.VMEM((L, 3 * C), cdtype),                  # QKV activations
                pltpu.VMEM((TQ, C), jnp.float32),                # out-proj accumulator
            ],
        )

        n_wbuf = 1 if single_buffer_weights else 2
        vmem_est = (
            2 * L * C * itemsize                 # x (double-buffered across b)
            + 2 * TQ * L                         # int8 mask tiles (double-buffered)
            + 2 * TQ * C * itemsize              # output tiles (double-buffered)
            + n_wbuf * (3 * C * C * itemsize + C * C * itemsize + 16 * C)  # weights/biases
            + L * 3 * C * itemsize               # qkv scratch
            + TQ * C * 4                         # accumulator scratch
            + 3 * TQ * L * 4                     # live f32 scores / softmax temporaries
        )
        vmem_limit = int(min(64 * 1024 * 1024,
                             max(int(1.5 * vmem_est), 16 * 1024 * 1024)))

        flops = 8 * B * L * C * C + 4 * B * L * L * C
        bytes_accessed = (2 * B * L * C * itemsize      # x + out
                          + B * L * L                   # int8 mask
                          + 4 * C * C * itemsize        # weights
                          + 16 * C)                     # biases
        cost = pl.CostEstimate(flops=flops,
                               transcendentals=B * H * L * L,
                               bytes_accessed=bytes_accessed)

        return pl.pallas_call(
            functools.partial(mhsa_kernel, num_heads=H, d_k=d_k, q_tile=TQ),
            out_shape=jax.ShapeDtypeStruct((B, L, C), x.dtype),
            grid_spec=grid_spec,
            compiler_params=pltpu.CompilerParams(
                dimension_semantics=("parallel", "arbitrary"),
                vmem_limit_bytes=vmem_limit),
            cost_estimate=cost,
        )

    try:
        return build(True)(x, mask_i8, wqkv, bqkv, wo_t, bo_r)
    except Exception:
        # Fallback if single-buffered pipeline_mode is unsupported in this build.
        return build(False)(x, mask_i8, wqkv, bqkv, wo_t, bo_r)


def mhsa_reference(x, mask, params, num_heads):
    """Pure-JAX reference mirroring the PyTorch module (eval mode)."""
    wq, bq, wk, bk, wv, bv, wo, bo = params
    B, L, C = x.shape
    H = num_heads
    d_k = C // H

    def proj(w, b):
        return (x @ w.T + b).reshape(B, L, H, d_k).transpose(0, 2, 1, 3)

    q, k, v = proj(wq, bq), proj(wk, bk), proj(wv, bv)
    scores = jnp.einsum('bhlc,bhkc->bhlk', q, k) / math.sqrt(d_k)
    scores = jnp.where(mask[:, None] == 0, -1e9, scores)
    p = jax.nn.softmax(scores, axis=-1)
    o = jnp.einsum('bhlk,bhkc->bhlc', p, v)
    o = o.transpose(0, 2, 1, 3).reshape(B, L, C)
    return o @ wo.T + bo


if __name__ == "__main__":
    B, L, C, H = 2, 8, 32, 4         # d_model=32, num_heads=4 -> d_k=8

    key = jax.random.PRNGKey(0)
    keys = jax.random.split(key, 10)
    bound = 1.0 / math.sqrt(C)       # PyTorch nn.Linear default init range

    def lin_params(kw, kb):
        w = jax.random.uniform(kw, (C, C), jnp.float32, -bound, bound)
        b = jax.random.uniform(kb, (C,), jnp.float32, -bound, bound)
        return w, b

    wq, bq = lin_params(keys[0], keys[1])
    wk, bk = lin_params(keys[2], keys[3])
    wv, bv = lin_params(keys[4], keys[5])
    wo, bo = lin_params(keys[6], keys[7])
    params = (wq, bq, wk, bk, wv, bv, wo, bo)

    x = jax.random.normal(keys[8], (B, L, C), jnp.float32)
    # Causal mask (1 = attend, 0 = masked), broadcast over heads like PyTorch.
    mask = jnp.broadcast_to(jnp.tril(jnp.ones((L, L), jnp.float32)), (B, L, L))

    out = mhsa_forward(x, mask, params, H)
    out = jax.block_until_ready(out)

    ref = mhsa_reference(x, mask, params, H)
    assert out.shape == (B, L, C)
    assert jnp.allclose(out, ref, atol=1e-4, rtol=1e-4), "Pallas MHSA mismatch vs JAX reference"

    print("KERNEL_OK")
</pallas_src>

<mosaic_0001>
module attributes {stable_mosaic.version = 11 : i64} {
  func.func @mhsa_kernel(%arg0: i32, %arg1: i32, %arg2: memref<1x8x32xf32, #tpu.memory_space<vmem>>, %arg3: memref<1x8x8xi8, #tpu.memory_space<vmem>>, %arg4: memref<32x96xf32, #tpu.memory_space<vmem>>, %arg5: memref<1x96xf32, #tpu.memory_space<vmem>>, %arg6: memref<32x32xf32, #tpu.memory_space<vmem>>, %arg7: memref<1x32xf32, #tpu.memory_space<vmem>>, %arg8: memref<1x8x32xf32, #tpu.memory_space<vmem>>, %arg9: memref<8x96xf32, #tpu.memory_space<vmem>>, %arg10: memref<8x32xf32, #tpu.memory_space<vmem>>) attributes {dimension_semantics = [#tpu.dimension_semantics<parallel>, #tpu.dimension_semantics<arbitrary>], iteration_bounds = array<i64: 2, 1>, scalar_prefetch = 0 : i64, scratch_operands = 2 : i64, tpu.core_type = #tpu.core_type<tc>, window_params = [{transform_indices = @transform_0, window_bounds = array<i64: 1, 8, 32>}, {transform_indices = @transform_1, window_bounds = array<i64: 1, 8, 8>}, {pipeline_mode = #tpu.pipeline_mode<synchronous>, transform_indices = @transform_2, window_bounds = array<i64: 32, 96>}, {pipeline_mode = #tpu.pipeline_mode<synchronous>, transform_indices = @transform_3, window_bounds = array<i64: 1, 96>}, {pipeline_mode = #tpu.pipeline_mode<synchronous>, transform_indices = @transform_4, window_bounds = array<i64: 32, 32>}, {pipeline_mode = #tpu.pipeline_mode<synchronous>, transform_indices = @transform_5, window_bounds = array<i64: 1, 32>}, {transform_indices = @transform_6, window_bounds = array<i64: 1, 8, 32>}]} {
    %c0_i32 = arith.constant 0 : i32
    %0 = arith.cmpi eq, %arg1, %c0_i32 : i32
    %1 = arith.extui %0 : i1 to i32
    %c0_i32_0 = arith.constant 0 : i32
    %2 = arith.cmpi ne, %1, %c0_i32_0 : i32
    scf.if %2 {
      %c0_60 = arith.constant 0 : index
      %c0_61 = arith.constant 0 : index
      %c0_62 = arith.constant 0 : index
      %104 = vector.load %arg2[%c0_60, %c0_61, %c0_62] : memref<1x8x32xf32, #tpu.memory_space<vmem>>, vector<1x8x32xf32>
      %105 = vector.shape_cast %104 : vector<1x8x32xf32> to vector<8x32xf32>
      %c0_63 = arith.constant 0 : index
      %c0_64 = arith.constant 0 : index
      %106 = vector.load %arg4[%c0_63, %c0_64] : memref<32x96xf32, #tpu.memory_space<vmem>>, vector<32x96xf32>
      %cst_65 = arith.constant dense<0.000000e+00> : vector<8x96xf32>
      %107 = tpu.matmul %105, %106, %cst_65 {dimension_numbers = #tpu.dot_dimension_numbers<[1], [0], [0], [1], [0, 0, 1, 1], [], []>} : vector<8x32xf32>, vector<32x96xf32>, vector<8x96xf32> -> vector<8x96xf32>
      %c0_66 = arith.constant 0 : index
      %c0_67 = arith.constant 0 : index
      %108 = vector.load %arg5[%c0_66, %c0_67] : memref<1x96xf32, #tpu.memory_space<vmem>>, vector<1x96xf32>
      %109 = vector.broadcast %108 : vector<1x96xf32> to vector<8x96xf32>
      %110 = arith.addf %107, %109 : vector<8x96xf32>
      %c0_68 = arith.constant 0 : index
      %c0_69 = arith.constant 0 : index
      %111 = vector.load %arg9[%c0_68, %c0_69] : memref<8x96xf32, #tpu.memory_space<vmem>>, vector<8x96xf32>
      tpu.vector_store %arg9[%c0_68, %c0_69], %110 {strides = array<i32>} : memref<8x96xf32, #tpu.memory_space<vmem>>, vector<8x96xf32>,
    } else {
    }
    %c0 = arith.constant 0 : index
    %c0_1 = arith.constant 0 : index
    %c0_2 = arith.constant 0 : index
    %3 = vector.load %arg3[%c0, %c0_1, %c0_2] : memref<1x8x8xi8, #tpu.memory_space<vmem>>, vector<1x8x8xi8>
    %4 = vector.shape_cast %3 : vector<1x8x8xi8> to vector<8x8xi8>
    %5 = arith.sitofp %4 : vector<8x8xi8> to vector<8x8xf32>
    %cst = arith.constant 0.000000e+00 : f32
    %6 = vector.broadcast %cst : f32 to vector<8x8xf32>
    %7 = arith.cmpf oeq, %5, %6 : vector<8x8xf32>
    %cst_3 = arith.constant -1.000000e+09 : f32
    %cst_4 = arith.constant 0.000000e+00 : f32
    %8 = vector.broadcast %cst_3 : f32 to vector<8x8xf32>
    %9 = vector.broadcast %cst_4 : f32 to vector<8x8xf32>
    %10 = arith.select %7, %8, %9 : vector<8x8xi1>, vector<8x8xf32>
    %c8_i32 = arith.constant 8 : i32
    %11 = arith.muli %arg1, %c8_i32 : i32
    %12 = tpu.assume_multiple %11, 8 : i32
    %13 = arith.index_cast %12 : i32 to index
    %c0_5 = arith.constant 0 : index
    %14 = vector.load %arg9[%13, %c0_5] : memref<8x96xf32, #tpu.memory_space<vmem>>, vector<8x32xf32>
    %15 = vector.extract_strided_slice %14 {offsets = [0, 0], sizes = [8, 8], strides = [1, 1]} : vector<8x32xf32> to vector<8x8xf32>
    %c0_6 = arith.constant 0 : index
    %c32 = arith.constant 32 : index
    %16 = vector.load %arg9[%c0_6, %c32] : memref<8x96xf32, #tpu.memory_space<vmem>>, vector<8x8xf32>
    %c0_7 = arith.constant 0 : index
    %c64 = arith.constant 64 : index
    %17 = vector.load %arg9[%c0_7, %c64] : memref<8x96xf32, #tpu.memory_space<vmem>>, vector<8x8xf32>
    %cst_8 = arith.constant dense<0.000000e+00> : vector<8x8xf32>
    %18 = tpu.matmul %15, %16, %cst_8 {dimension_numbers = #tpu.dot_dimension_numbers<[1], [1], [0], [0], [0, 0, 1, 0], [], []>} : vector<8x8xf32>, vector<8x8xf32>, vector<8x8xf32> -> vector<8x8xf32>
    %19 = arith.addf %18, %10 : vector<8x8xf32>
    %cst_9 = arith.constant dense<0xFF800000> : vector<8xf32>
    %20 = vector.multi_reduction <maximumf>, %19, %cst_9 [1] : vector<8x8xf32> to vector<8xf32>
    %21 = vector.shape_cast %20 : vector<8xf32> to vector<8x1xf32>
    %22 = vector.broadcast %21 : vector<8x1xf32> to vector<8x8xf32>
    %23 = arith.subf %19, %22 : vector<8x8xf32>
    %24 = math.exp %23 : vector<8x8xf32>
    %cst_10 = arith.constant dense<0.000000e+00> : vector<8xf32>
    %25 = vector.multi_reduction <add>, %24, %cst_10 [1] : vector<8x8xf32> to vector<8xf32>
    %26 = vector.shape_cast %25 : vector<8xf32> to vector<8x1xf32>
    %27 = tpu.reciprocal %26 : vector<8x1xf32> -> vector<8x1xf32>
    %28 = vector.broadcast %27 : vector<8x1xf32> to vector<8x8xf32>
    %29 = arith.mulf %24, %28 : vector<8x8xf32>
    %cst_11 = arith.constant dense<0.000000e+00> : vector<8x8xf32>
    %30 = tpu.matmul %29, %17, %cst_11 {dimension_numbers = #tpu.dot_dimension_numbers<[1], [0], [0], [1], [0, 0, 1, 1], [], []>} : vector<8x8xf32>, vector<8x8xf32>, vector<8x8xf32> -> vector<8x8xf32>
    %c0_12 = arith.constant 0 : index
    %c0_13 = arith.constant 0 : index
    %31 = vector.load %arg6[%c0_12, %c0_13] : memref<32x32xf32, #tpu.memory_space<vmem>>, vector<8x32xf32>
    %cst_14 = arith.constant dense<0.000000e+00> : vector<8x32xf32>
    %32 = tpu.matmul %30, %31, %cst_14 {dimension_numbers = #tpu.dot_dimension_numbers<[1], [0], [0], [1], [0, 0, 1, 1], [], []>} : vector<8x8xf32>, vector<8x32xf32>, vector<8x32xf32> -> vector<8x32xf32>
    %c0_15 = arith.constant 0 : index
    %c0_16 = arith.constant 0 : index
    %33 = vector.load %arg10[%c0_15, %c0_16] : memref<8x32xf32, #tpu.memory_space<vmem>>, vector<8x32xf32>
    tpu.vector_store %arg10[%c0_15, %c0_16], %32 {strides = array<i32>} : memref<8x32xf32, #tpu.memory_space<vmem>>, vector<8x32xf32>,
    %34 = vector.extract_strided_slice %14 {offsets = [0, 8], sizes = [8, 8], strides = [1, 1]} : vector<8x32xf32> to vector<8x8xf32>
    %c0_17 = arith.constant 0 : index
    %c40 = arith.constant 40 : index
    %35 = vector.load %arg9[%c0_17, %c40] : memref<8x96xf32, #tpu.memory_space<vmem>>, vector<8x8xf32>
    %c0_18 = arith.constant 0 : index
    %c72 = arith.constant 72 : index
    %36 = vector.load %arg9[%c0_18, %c72] : memref<8x96xf32, #tpu.memory_space<vmem>>, vector<8x8xf32>
    %cst_19 = arith.constant dense<0.000000e+00> : vector<8x8xf32>
    %37 = tpu.matmul %34, %35, %cst_19 {dimension_numbers = #tpu.dot_dimension_numbers<[1], [1], [0], [0], [0, 0, 1, 0], [], []>} : vector<8x8xf32>, vector<8x8xf32>, vector<8x8xf32> -> vector<8x8xf32>
    %38 = arith.addf %37, %10 : vector<8x8xf32>
    %cst_20 = arith.constant dense<0xFF800000> : vector<8xf32>
    %39 = vector.multi_reduction <maximumf>, %38, %cst_20 [1] : vector<8x8xf32> to vector<8xf32>
    %40 = vector.shape_cast %39 : vector<8xf32> to vector<8x1xf32>
    %41 = vector.broadcast %40 : vector<8x1xf32> to vector<8x8xf32>
    %42 = arith.subf %38, %41 : vector<8x8xf32>
    %43 = math.exp %42 : vector<8x8xf32>
    %cst_21 = arith.constant dense<0.000000e+00> : vector<8xf32>
    %44 = vector.multi_reduction <add>, %43, %cst_21 [1] : vector<8x8xf32> to vector<8xf32>
    %45 = vector.shape_cast %44 : vector<8xf32> to vector<8x1xf32>
    %46 = tpu.reciprocal %45 : vector<8x1xf32> -> vector<8x1xf32>
    %47 = vector.broadcast %46 : vector<8x1xf32> to vector<8x8xf32>
    %48 = arith.mulf %43, %47 : vector<8x8xf32>
    %cst_22 = arith.constant dense<0.000000e+00> : vector<8x8xf32>
    %49 = tpu.matmul %48, %36, %cst_22 {dimension_numbers = #tpu.dot_dimension_numbers<[1], [0], [0], [1], [0, 0, 1, 1], [], []>} : vector<8x8xf32>, vector<8x8xf32>, vector<8x8xf32> -> vector<8x8xf32>
    %c8 = arith.constant 8 : index
    %c0_23 = arith.constant 0 : index
    %50 = vector.load %arg6[%c8, %c0_23] : memref<32x32xf32, #tpu.memory_space<vmem>>, vector<8x32xf32>
    %cst_24 = arith.constant dense<0.000000e+00> : vector<8x32xf32>
    %51 = tpu.matmul %49, %50, %cst_24 {dimension_numbers = #tpu.dot_dimension_numbers<[1], [0], [0], [1], [0, 0, 1, 1], [], []>} : vector<8x8xf32>, vector<8x32xf32>, vector<8x32xf32> -> vector<8x32xf32>
    %c0_25 = arith.constant 0 : index
    %c0_26 = arith.constant 0 : index
    %52 = vector.load %arg10[%c0_25, %c0_26] : memref<8x32xf32, #tpu.memory_space<vmem>>, vector<8x32xf32>
    %53 = arith.addf %52, %51 : vector<8x32xf32>
    %c0_27 = arith.constant 0 : index
    %c0_28 = arith.constant 0 : index
    %54 = vector.load %arg10[%c0_27, %c0_28] : memref<8x32xf32, #tpu.memory_space<vmem>>, vector<8x32xf32>
    tpu.vector_store %arg10[%c0_27, %c0_28], %53 {strides = array<i32>} : memref<8x32xf32, #tpu.memory_space<vmem>>, vector<8x32xf32>,
    %55 = vector.extract_strided_slice %14 {offsets = [0, 16], sizes = [8, 8], strides = [1, 1]} : vector<8x32xf32> to vector<8x8xf32>
    %c0_29 = arith.constant 0 : index
    %c48 = arith.constant 48 : index
    %56 = vector.load %arg9[%c0_29, %c48] : memref<8x96xf32, #tpu.memory_space<vmem>>, vector<8x8xf32>
    %c0_30 = arith.constant 0 : index
    %c80 = arith.constant 80 : index
    %57 = vector.load %arg9[%c0_30, %c80] : memref<8x96xf32, #tpu.memory_space<vmem>>, vector<8x8xf32>
    %cst_31 = arith.constant dense<0.000000e+00> : vector<8x8xf32>
    %58 = tpu.matmul %55, %56, %cst_31 {dimension_numbers = #tpu.dot_dimension_numbers<[1], [1], [0], [0], [0, 0, 1, 0], [], []>} : vector<8x8xf32>, vector<8x8xf32>, vector<8x8xf32> -> vector<8x8xf32>
    %59 = arith.addf %58, %10 : vector<8x8xf32>
    %cst_32 = arith.constant dense<0xFF800000> : vector<8xf32>
    %60 = vector.multi_reduction <maximumf>, %59, %cst_32 [1] : vector<8x8xf32> to vector<8xf32>
    %61 = vector.shape_cast %60 : vector<8xf32> to vector<8x1xf32>
    %62 = vector.broadcast %61 : vector<8x1xf32> to vector<8x8xf32>
    %63 = arith.subf %59, %62 : vector<8x8xf32>
    %64 = math.exp %63 : vector<8x8xf32>
    %cst_33 = arith.constant dense<0.000000e+00> : vector<8xf32>
    %65 = vector.multi_reduction <add>, %64, %cst_33 [1] : vector<8x8xf32> to vector<8xf32>
    %66 = vector.shape_cast %65 : vector<8xf32> to vector<8x1xf32>
    %67 = tpu.reciprocal %66 : vector<8x1xf32> -> vector<8x1xf32>
    %68 = vector.broadcast %67 : vector<8x1xf32> to vector<8x8xf32>
    %69 = arith.mulf %64, %68 : vector<8x8xf32>
    %cst_34 = arith.constant dense<0.000000e+00> : vector<8x8xf32>
    %70 = tpu.matmul %69, %57, %cst_34 {dimension_numbers = #tpu.dot_dimension_numbers<[1], [0], [0], [1], [0, 0, 1, 1], [], []>} : vector<8x8xf32>, vector<8x8xf32>, vector<8x8xf32> -> vector<8x8xf32>
    %c16 = arith.constant 16 : index
    %c0_35 = arith.constant 0 : index
    %71 = vector.load %arg6[%c16, %c0_35] : memref<32x32xf32, #tpu.memory_space<vmem>>, vector<8x32xf32>
    %cst_36 = arith.constant dense<0.000000e+00> : vector<8x32xf32>
    %72 = tpu.matmul %70, %71, %cst_36 {dimension_numbers = #tpu.dot_dimension_numbers<[1], [0], [0], [1], [0, 0, 1, 1], [], []>} : vector<8x8xf32>, vector<8x32xf32>, vector<8x32xf32> -> vector<8x32xf32>
    %c0_37 = arith.constant 0 : index
    %c0_38 = arith.constant 0 : index
    %73 = vector.load %arg10[%c0_37, %c0_38] : memref<8x32xf32, #tpu.memory_space<vmem>>, vector<8x32xf32>
    %74 = arith.addf %73, %72 : vector<8x32xf32>
    %c0_39 = arith.constant 0 : index
    %c0_40 = arith.constant 0 : index
    %75 = vector.load %arg10[%c0_39, %c0_40] : memref<8x32xf32, #tpu.memory_space<vmem>>, vector<8x32xf32>
    tpu.vector_store %arg10[%c0_39, %c0_40], %74 {strides = array<i32>} : memref<8x32xf32, #tpu.memory_space<vmem>>, vector<8x32xf32>,
    %76 = vector.extract_strided_slice %14 {offsets = [0, 24], sizes = [8, 8], strides = [1, 1]} : vector<8x32xf32> to vector<8x8xf32>
    %c0_41 = arith.constant 0 : index
    %c56 = arith.constant 56 : index
    %77 = vector.load %arg9[%c0_41, %c56] : memref<8x96xf32, #tpu.memory_space<vmem>>, vector<8x8xf32>
    %c0_42 = arith.constant 0 : index
    %c88 = arith.constant 88 : index
    %78 = vector.load %arg9[%c0_42, %c88] : memref<8x96xf32, #tpu.memory_space<vmem>>, vector<8x8xf32>
    %cst_43 = arith.constant dense<0.000000e+00> : vector<8x8xf32>
    %79 = tpu.matmul %76, %77, %cst_43 {dimension_numbers = #tpu.dot_dimension_numbers<[1], [1], [0], [0], [0, 0, 1, 0], [], []>} : vector<8x8xf32>, vector<8x8xf32>, vector<8x8xf32> -> vector<8x8xf32>
    %80 = arith.addf %79, %10 : vector<8x8xf32>
    %cst_44 = arith.constant dense<0xFF800000> : vector<8xf32>
    %81 = vector.multi_reduction <maximumf>, %80, %cst_44 [1] : vector<8x8xf32> to vector<8xf32>
    %82 = vector.shape_cast %81 : vector<8xf32> to vector<8x1xf32>
    %83 = vector.broadcast %82 : vector<8x1xf32> to vector<8x8xf32>
    %84 = arith.subf %80, %83 : vector<8x8xf32>
    %85 = math.exp %84 : vector<8x8xf32>
    %cst_45 = arith.constant dense<0.000000e+00> : vector<8xf32>
    %86 = vector.multi_reduction <add>, %85, %cst_45 [1] : vector<8x8xf32> to vector<8xf32>
    %87 = vector.shape_cast %86 : vector<8xf32> to vector<8x1xf32>
    %88 = tpu.reciprocal %87 : vector<8x1xf32> -> vector<8x1xf32>
    %89 = vector.broadcast %88 : vector<8x1xf32> to vector<8x8xf32>
    %90 = arith.mulf %85, %89 : vector<8x8xf32>
    %cst_46 = arith.constant dense<0.000000e+00> : vector<8x8xf32>
    %91 = tpu.matmul %90, %78, %cst_46 {dimension_numbers = #tpu.dot_dimension_numbers<[1], [0], [0], [1], [0, 0, 1, 1], [], []>} : vector<8x8xf32>, vector<8x8xf32>, vector<8x8xf32> -> vector<8x8xf32>
    %c24 = arith.constant 24 : index
    %c0_47 = arith.constant 0 : index
    %92 = vector.load %arg6[%c24, %c0_47] : memref<32x32xf32, #tpu.memory_space<vmem>>, vector<8x32xf32>
    %cst_48 = arith.constant dense<0.000000e+00> : vector<8x32xf32>
    %93 = tpu.matmul %91, %92, %cst_48 {dimension_numbers = #tpu.dot_dimension_numbers<[1], [0], [0], [1], [0, 0, 1, 1], [], []>} : vector<8x8xf32>, vector<8x32xf32>, vector<8x32xf32> -> vector<8x32xf32>
    %c0_49 = arith.constant 0 : index
    %c0_50 = arith.constant 0 : index
    %94 = vector.load %arg10[%c0_49, %c0_50] : memref<8x32xf32, #tpu.memory_space<vmem>>, vector<8x32xf32>
    %95 = arith.addf %94, %93 : vector<8x32xf32>
    %c0_51 = arith.constant 0 : index
    %c0_52 = arith.constant 0 : index
    %96 = vector.load %arg10[%c0_51, %c0_52] : memref<8x32xf32, #tpu.memory_space<vmem>>, vector<8x32xf32>
    tpu.vector_store %arg10[%c0_51, %c0_52], %95 {strides = array<i32>} : memref<8x32xf32, #tpu.memory_space<vmem>>, vector<8x32xf32>,
    %c0_53 = arith.constant 0 : index
    %c0_54 = arith.constant 0 : index
    %97 = vector.load %arg10[%c0_53, %c0_54] : memref<8x32xf32, #tpu.memory_space<vmem>>, vector<8x32xf32>
    %c0_55 = arith.constant 0 : index
    %c0_56 = arith.constant 0 : index
    %98 = vector.load %arg7[%c0_55, %c0_56] : memref<1x32xf32, #tpu.memory_space<vmem>>, vector<1x32xf32>
    %99 = vector.broadcast %98 : vector<1x32xf32> to vector<8x32xf32>
    %100 = arith.addf %97, %99 : vector<8x32xf32>
    %c0_57 = arith.constant 0 : index
    %c0_58 = arith.constant 0 : index
    %c0_59 = arith.constant 0 : index
    %101 = vector.load %arg8[%c0_57, %c0_58, %c0_59] : memref<1x8x32xf32, #tpu.memory_space<vmem>>, vector<1x8x32xf32>
    %102 = vector.shape_cast %101 : vector<1x8x32xf32> to vector<8x32xf32>
    %103 = vector.shape_cast %100 : vector<8x32xf32> to vector<1x8x32xf32>
    tpu.vector_store %arg8[%c0_57, %c0_58, %c0_59], %103 {strides = array<i32>} : memref<1x8x32xf32, #tpu.memory_space<vmem>>, vector<1x8x32xf32>,
    return
  }
  func.func @transform_0(%arg0: i32, %arg1: i32) -> (i32, i32, i32) {
    %c0_i32 = arith.constant 0 : i32
    %c0_i32_0 = arith.constant 0 : i32
    %c0_i32_1 = arith.constant 0 : i32
    return %arg0, %c0_i32, %c0_i32_0 : i32, i32, i32
  }
  func.func @transform_1(%arg0: i32, %arg1: i32) -> (i32, i32, i32) {
    %c0_i32 = arith.constant 0 : i32
    %c0_i32_0 = arith.constant 0 : i32
    return %arg0, %arg1, %c0_i32 : i32, i32, i32
  }
  func.func @transform_2(%arg0: i32, %arg1: i32) -> (i32, i32) {
    %c0_i32 = arith.constant 0 : i32
    %c0_i32_0 = arith.constant 0 : i32
    %c0_i32_1 = arith.constant 0 : i32
    return %c0_i32, %c0_i32_0 : i32, i32
  }
  func.func @transform_3(%arg0: i32, %arg1: i32) -> (i32, i32) {
    %c0_i32 = arith.constant 0 : i32
    %c0_i32_0 = arith.constant 0 : i32
    %c0_i32_1 = arith.constant 0 : i32
    return %c0_i32, %c0_i32_0 : i32, i32
  }
  func.func @transform_4(%arg0: i32, %arg1: i32) -> (i32, i32) {
    %c0_i32 = arith.constant 0 : i32
    %c0_i32_0 = arith.constant 0 : i32
    %c0_i32_1 = arith.constant 0 : i32
    return %c0_i32, %c0_i32_0 : i32, i32
  }
  func.func @transform_5(%arg0: i32, %arg1: i32) -> (i32, i32) {
    %c0_i32 = arith.constant 0 : i32
    %c0_i32_0 = arith.constant 0 : i32
    %c0_i32_1 = arith.constant 0 : i32
    return %c0_i32, %c0_i32_0 : i32, i32
  }
  func.func @transform_6(%arg0: i32, %arg1: i32) -> (i32, i32, i32) {
    %c0_i32 = arith.constant 0 : i32
    %c0_i32_0 = arith.constant 0 : i32
    return %arg0, %arg1, %c0_i32 : i32, i32, i32
  }
}

module attributes {stable_mosaic.version = 11 : i64} {
  func.func @mhsa_kernel(%arg0: i32, %arg1: i32, %arg2: memref<1x8x32xf32, #tpu.memory_space<vmem>>, %arg3: memref<1x8x8xi8, #tpu.memory_space<vmem>>, %arg4: memref<32x96xf32, #tpu.memory_space<vmem>>, %arg5: memref<1x96xf32, #tpu.memory_space<vmem>>, %arg6: memref<32x32xf32, #tpu.memory_space<vmem>>, %arg7: memref<1x32xf32, #tpu.memory_space<vmem>>, %arg8: memref<1x8x32xf32, #tpu.memory_space<vmem>>, %arg9: memref<8x96xf32, #tpu.memory_space<vmem>>, %arg10: memref<8x32xf32, #tpu.memory_space<vmem>>) attributes {dimension_semantics = [#tpu.dimension_semantics<parallel>, #tpu.dimension_semantics<arbitrary>], iteration_bounds = array<i64: 2, 1>, scalar_prefetch = 0 : i64, scratch_operands = 2 : i64, tpu.core_type = #tpu.core_type<tc>, window_params = [{transform_indices = @transform_0, window_bounds = array<i64: 1, 8, 32>}, {transform_indices = @transform_1, window_bounds = array<i64: 1, 8, 8>}, {pipeline_mode = #tpu.pipeline_mode<synchronous>, transform_indices = @transform_2, window_bounds = array<i64: 32, 96>}, {pipeline_mode = #tpu.pipeline_mode<synchronous>, transform_indices = @transform_3, window_bounds = array<i64: 1, 96>}, {pipeline_mode = #tpu.pipeline_mode<synchronous>, transform_indices = @transform_4, window_bounds = array<i64: 32, 32>}, {pipeline_mode = #tpu.pipeline_mode<synchronous>, transform_indices = @transform_5, window_bounds = array<i64: 1, 32>}, {transform_indices = @transform_6, window_bounds = array<i64: 1, 8, 32>}]} {
    %c0_i32 = arith.constant 0 : i32
    %0 = arith.cmpi eq, %arg1, %c0_i32 : i32
    %1 = arith.extui %0 : i1 to i32
    %c0_i32_0 = arith.constant 0 : i32
    %2 = arith.cmpi ne, %1, %c0_i32_0 : i32
    scf.if %2 {
      %c0_60 = arith.constant 0 : index
      %c0_61 = arith.constant 0 : index
      %c0_62 = arith.constant 0 : index
      %104 = vector.load %arg2[%c0_60, %c0_61, %c0_62] : memref<1x8x32xf32, #tpu.memory_space<vmem>>, vector<1x8x32xf32>
      %105 = vector.shape_cast %104 : vector<1x8x32xf32> to vector<8x32xf32>
      %c0_63 = arith.constant 0 : index
      %c0_64 = arith.constant 0 : index
      %106 = vector.load %arg4[%c0_63, %c0_64] : memref<32x96xf32, #tpu.memory_space<vmem>>, vector<32x96xf32>
      %cst_65 = arith.constant dense<0.000000e+00> : vector<8x96xf32>
      %107 = tpu.matmul %105, %106, %cst_65 {dimension_numbers = #tpu.dot_dimension_numbers<[1], [0], [0], [1], [0, 0, 1, 1], [], []>} : vector<8x32xf32>, vector<32x96xf32>, vector<8x96xf32> -> vector<8x96xf32>
      %c0_66 = arith.constant 0 : index
      %c0_67 = arith.constant 0 : index
      %108 = vector.load %arg5[%c0_66, %c0_67] : memref<1x96xf32, #tpu.memory_space<vmem>>, vector<1x96xf32>
      %109 = vector.broadcast %108 : vector<1x96xf32> to vector<8x96xf32>
      %110 = arith.addf %107, %109 : vector<8x96xf32>
      %c0_68 = arith.constant 0 : index
      %c0_69 = arith.constant 0 : index
      %111 = vector.load %arg9[%c0_68, %c0_69] : memref<8x96xf32, #tpu.memory_space<vmem>>, vector<8x96xf32>
      tpu.vector_store %arg9[%c0_68, %c0_69], %110 {strides = array<i32>} : memref<8x96xf32, #tpu.memory_space<vmem>>, vector<8x96xf32>,
    } else {
    }
    %c0 = arith.constant 0 : index
    %c0_1 = arith.constant 0 : index
    %c0_2 = arith.constant 0 : index
    %3 = vector.load %arg3[%c0, %c0_1, %c0_2] : memref<1x8x8xi8, #tpu.memory_space<vmem>>, vector<1x8x8xi8>
    %4 = vector.shape_cast %3 : vector<1x8x8xi8> to vector<8x8xi8>
    %5 = arith.sitofp %4 : vector<8x8xi8> to vector<8x8xf32>
    %cst = arith.constant 0.000000e+00 : f32
    %6 = vector.broadcast %cst : f32 to vector<8x8xf32>
    %7 = arith.cmpf oeq, %5, %6 : vector<8x8xf32>
    %cst_3 = arith.constant -1.000000e+09 : f32
    %cst_4 = arith.constant 0.000000e+00 : f32
    %8 = vector.broadcast %cst_3 : f32 to vector<8x8xf32>
    %9 = vector.broadcast %cst_4 : f32 to vector<8x8xf32>
    %10 = arith.select %7, %8, %9 : vector<8x8xi1>, vector<8x8xf32>
    %c8_i32 = arith.constant 8 : i32
    %11 = arith.muli %arg1, %c8_i32 : i32
    %12 = tpu.assume_multiple %11, 8 : i32
    %13 = arith.index_cast %12 : i32 to index
    %c0_5 = arith.constant 0 : index
    %14 = vector.load %arg9[%13, %c0_5] : memref<8x96xf32, #tpu.memory_space<vmem>>, vector<8x32xf32>
    %15 = vector.extract_strided_slice %14 {offsets = [0, 0], sizes = [8, 8], strides = [1, 1]} : vector<8x32xf32> to vector<8x8xf32>
    %c0_6 = arith.constant 0 : index
    %c32 = arith.constant 32 : index
    %16 = vector.load %arg9[%c0_6, %c32] : memref<8x96xf32, #tpu.memory_space<vmem>>, vector<8x8xf32>
    %c0_7 = arith.constant 0 : index
    %c64 = arith.constant 64 : index
    %17 = vector.load %arg9[%c0_7, %c64] : memref<8x96xf32, #tpu.memory_space<vmem>>, vector<8x8xf32>
    %cst_8 = arith.constant dense<0.000000e+00> : vector<8x8xf32>
    %18 = tpu.matmul %15, %16, %cst_8 {dimension_numbers = #tpu.dot_dimension_numbers<[1], [1], [0], [0], [0, 0, 1, 0], [], []>} : vector<8x8xf32>, vector<8x8xf32>, vector<8x8xf32> -> vector<8x8xf32>
    %19 = arith.addf %18, %10 : vector<8x8xf32>
    %cst_9 = arith.constant dense<0xFF800000> : vector<8xf32>
    %20 = vector.multi_reduction <maximumf>, %19, %cst_9 [1] : vector<8x8xf32> to vector<8xf32>
    %21 = vector.shape_cast %20 : vector<8xf32> to vector<8x1xf32>
    %22 = vector.broadcast %21 : vector<8x1xf32> to vector<8x8xf32>
    %23 = arith.subf %19, %22 : vector<8x8xf32>
    %24 = math.exp %23 : vector<8x8xf32>
    %cst_10 = arith.constant dense<0.000000e+00> : vector<8xf32>
    %25 = vector.multi_reduction <add>, %24, %cst_10 [1] : vector<8x8xf32> to vector<8xf32>
    %26 = vector.shape_cast %25 : vector<8xf32> to vector<8x1xf32>
    %27 = tpu.reciprocal %26 : vector<8x1xf32> -> vector<8x1xf32>
    %28 = vector.broadcast %27 : vector<8x1xf32> to vector<8x8xf32>
    %29 = arith.mulf %24, %28 : vector<8x8xf32>
    %cst_11 = arith.constant dense<0.000000e+00> : vector<8x8xf32>
    %30 = tpu.matmul %29, %17, %cst_11 {dimension_numbers = #tpu.dot_dimension_numbers<[1], [0], [0], [1], [0, 0, 1, 1], [], []>} : vector<8x8xf32>, vector<8x8xf32>, vector<8x8xf32> -> vector<8x8xf32>
    %c0_12 = arith.constant 0 : index
    %c0_13 = arith.constant 0 : index
    %31 = vector.load %arg6[%c0_12, %c0_13] : memref<32x32xf32, #tpu.memory_space<vmem>>, vector<8x32xf32>
    %cst_14 = arith.constant dense<0.000000e+00> : vector<8x32xf32>
    %32 = tpu.matmul %30, %31, %cst_14 {dimension_numbers = #tpu.dot_dimension_numbers<[1], [0], [0], [1], [0, 0, 1, 1], [], []>} : vector<8x8xf32>, vector<8x32xf32>, vector<8x32xf32> -> vector<8x32xf32>
    %c0_15 = arith.constant 0 : index
    %c0_16 = arith.constant 0 : index
    %33 = vector.load %arg10[%c0_15, %c0_16] : memref<8x32xf32, #tpu.memory_space<vmem>>, vector<8x32xf32>
    tpu.vector_store %arg10[%c0_15, %c0_16], %32 {strides = array<i32>} : memref<8x32xf32, #tpu.memory_space<vmem>>, vector<8x32xf32>,
    %34 = vector.extract_strided_slice %14 {offsets = [0, 8], sizes = [8, 8], strides = [1, 1]} : vector<8x32xf32> to vector<8x8xf32>
    %c0_17 = arith.constant 0 : index
    %c40 = arith.constant 40 : index
    %35 = vector.load %arg9[%c0_17, %c40] : memref<8x96xf32, #tpu.memory_space<vmem>>, vector<8x8xf32>
    %c0_18 = arith.constant 0 : index
    %c72 = arith.constant 72 : index
    %36 = vector.load %arg9[%c0_18, %c72] : memref<8x96xf32, #tpu.memory_space<vmem>>, vector<8x8xf32>
    %cst_19 = arith.constant dense<0.000000e+00> : vector<8x8xf32>
    %37 = tpu.matmul %34, %35, %cst_19 {dimension_numbers = #tpu.dot_dimension_numbers<[1], [1], [0], [0], [0, 0, 1, 0], [], []>} : vector<8x8xf32>, vector<8x8xf32>, vector<8x8xf32> -> vector<8x8xf32>
    %38 = arith.addf %37, %10 : vector<8x8xf32>
    %cst_20 = arith.constant dense<0xFF800000> : vector<8xf32>
    %39 = vector.multi_reduction <maximumf>, %38, %cst_20 [1] : vector<8x8xf32> to vector<8xf32>
    %40 = vector.shape_cast %39 : vector<8xf32> to vector<8x1xf32>
    %41 = vector.broadcast %40 : vector<8x1xf32> to vector<8x8xf32>
    %42 = arith.subf %38, %41 : vector<8x8xf32>
    %43 = math.exp %42 : vector<8x8xf32>
    %cst_21 = arith.constant dense<0.000000e+00> : vector<8xf32>
    %44 = vector.multi_reduction <add>, %43, %cst_21 [1] : vector<8x8xf32> to vector<8xf32>
    %45 = vector.shape_cast %44 : vector<8xf32> to vector<8x1xf32>
    %46 = tpu.reciprocal %45 : vector<8x1xf32> -> vector<8x1xf32>
    %47 = vector.broadcast %46 : vector<8x1xf32> to vector<8x8xf32>
    %48 = arith.mulf %43, %47 : vector<8x8xf32>
    %cst_22 = arith.constant dense<0.000000e+00> : vector<8x8xf32>
    %49 = tpu.matmul %48, %36, %cst_22 {dimension_numbers = #tpu.dot_dimension_numbers<[1], [0], [0], [1], [0, 0, 1, 1], [], []>} : vector<8x8xf32>, vector<8x8xf32>, vector<8x8xf32> -> vector<8x8xf32>
    %c8 = arith.constant 8 : index
    %c0_23 = arith.constant 0 : index
    %50 = vector.load %arg6[%c8, %c0_23] : memref<32x32xf32, #tpu.memory_space<vmem>>, vector<8x32xf32>
    %cst_24 = arith.constant dense<0.000000e+00> : vector<8x32xf32>
    %51 = tpu.matmul %49, %50, %cst_24 {dimension_numbers = #tpu.dot_dimension_numbers<[1], [0], [0], [1], [0, 0, 1, 1], [], []>} : vector<8x8xf32>, vector<8x32xf32>, vector<8x32xf32> -> vector<8x32xf32>
    %c0_25 = arith.constant 0 : index
    %c0_26 = arith.constant 0 : index
    %52 = vector.load %arg10[%c0_25, %c0_26] : memref<8x32xf32, #tpu.memory_space<vmem>>, vector<8x32xf32>
    %53 = arith.addf %52, %51 : vector<8x32xf32>
    %c0_27 = arith.constant 0 : index
    %c0_28 = arith.constant 0 : index
    %54 = vector.load %arg10[%c0_27, %c0_28] : memref<8x32xf32, #tpu.memory_space<vmem>>, vector<8x32xf32>
    tpu.vector_store %arg10[%c0_27, %c0_28], %53 {strides = array<i32>} : memref<8x32xf32, #tpu.memory_space<vmem>>, vector<8x32xf32>,
    %55 = vector.extract_strided_slice %14 {offsets = [0, 16], sizes = [8, 8], strides = [1, 1]} : vector<8x32xf32> to vector<8x8xf32>
    %c0_29 = arith.constant 0 : index
    %c48 = arith.constant 48 : index
    %56 = vector.load %arg9[%c0_29, %c48] : memref<8x96xf32, #tpu.memory_space<vmem>>, vector<8x8xf32>
    %c0_30 = arith.constant 0 : index
    %c80 = arith.constant 80 : index
    %57 = vector.load %arg9[%c0_30, %c80] : memref<8x96xf32, #tpu.memory_space<vmem>>, vector<8x8xf32>
    %cst_31 = arith.constant dense<0.000000e+00> : vector<8x8xf32>
    %58 = tpu.matmul %55, %56, %cst_31 {dimension_numbers = #tpu.dot_dimension_numbers<[1], [1], [0], [0], [0, 0, 1, 0], [], []>} : vector<8x8xf32>, vector<8x8xf32>, vector<8x8xf32> -> vector<8x8xf32>
    %59 = arith.addf %58, %10 : vector<8x8xf32>
    %cst_32 = arith.constant dense<0xFF800000> : vector<8xf32>
    %60 = vector.multi_reduction <maximumf>, %59, %cst_32 [1] : vector<8x8xf32> to vector<8xf32>
    %61 = vector.shape_cast %60 : vector<8xf32> to vector<8x1xf32>
    %62 = vector.broadcast %61 : vector<8x1xf32> to vector<8x8xf32>
    %63 = arith.subf %59, %62 : vector<8x8xf32>
    %64 = math.exp %63 : vector<8x8xf32>
    %cst_33 = arith.constant dense<0.000000e+00> : vector<8xf32>
    %65 = vector.multi_reduction <add>, %64, %cst_33 [1] : vector<8x8xf32> to vector<8xf32>
    %66 = vector.shape_cast %65 : vector<8xf32> to vector<8x1xf32>
    %67 = tpu.reciprocal %66 : vector<8x1xf32> -> vector<8x1xf32>
    %68 = vector.broadcast %67 : vector<8x1xf32> to vector<8x8xf32>
    %69 = arith.mulf %64, %68 : vector<8x8xf32>
    %cst_34 = arith.constant dense<0.000000e+00> : vector<8x8xf32>
    %70 = tpu.matmul %69, %57, %cst_34 {dimension_numbers = #tpu.dot_dimension_numbers<[1], [0], [0], [1], [0, 0, 1, 1], [], []>} : vector<8x8xf32>, vector<8x8xf32>, vector<8x8xf32> -> vector<8x8xf32>
    %c16 = arith.constant 16 : index
    %c0_35 = arith.constant 0 : index
    %71 = vector.load %arg6[%c16, %c0_35] : memref<32x32xf32, #tpu.memory_space<vmem>>, vector<8x32xf32>
    %cst_36 = arith.constant dense<0.000000e+00> : vector<8x32xf32>
    %72 = tpu.matmul %70, %71, %cst_36 {dimension_numbers = #tpu.dot_dimension_numbers<[1], [0], [0], [1], [0, 0, 1, 1], [], []>} : vector<8x8xf32>, vector<8x32xf32>, vector<8x32xf32> -> vector<8x32xf32>
    %c0_37 = arith.constant 0 : index
    %c0_38 = arith.constant 0 : index
    %73 = vector.load %arg10[%c0_37, %c0_38] : memref<8x32xf32, #tpu.memory_space<vmem>>, vector<8x32xf32>
    %74 = arith.addf %73, %72 : vector<8x32xf32>
    %c0_39 = arith.constant 0 : index
    %c0_40 = arith.constant 0 : index
    %75 = vector.load %arg10[%c0_39, %c0_40] : memref<8x32xf32, #tpu.memory_space<vmem>>, vector<8x32xf32>
    tpu.vector_store %arg10[%c0_39, %c0_40], %74 {strides = array<i32>} : memref<8x32xf32, #tpu.memory_space<vmem>>, vector<8x32xf32>,
    %76 = vector.extract_strided_slice %14 {offsets = [0, 24], sizes = [8, 8], strides = [1, 1]} : vector<8x32xf32> to vector<8x8xf32>
    %c0_41 = arith.constant 0 : index
    %c56 = arith.constant 56 : index
    %77 = vector.load %arg9[%c0_41, %c56] : memref<8x96xf32, #tpu.memory_space<vmem>>, vector<8x8xf32>
    %c0_42 = arith.constant 0 : index
    %c88 = arith.constant 88 : index
    %78 = vector.load %arg9[%c0_42, %c88] : memref<8x96xf32, #tpu.memory_space<vmem>>, vector<8x8xf32>
    %cst_43 = arith.constant dense<0.000000e+00> : vector<8x8xf32>
    %79 = tpu.matmul %76, %77, %cst_43 {dimension_numbers = #tpu.dot_dimension_numbers<[1], [1], [0], [0], [0, 0, 1, 0], [], []>} : vector<8x8xf32>, vector<8x8xf32>, vector<8x8xf32> -> vector<8x8xf32>
    %80 = arith.addf %79, %10 : vector<8x8xf32>
    %cst_44 = arith.constant dense<0xFF800000> : vector<8xf32>
    %81 = vector.multi_reduction <maximumf>, %80, %cst_44 [1] : vector<8x8xf32> to vector<8xf32>
    %82 = vector.shape_cast %81 : vector<8xf32> to vector<8x1xf32>
    %83 = vector.broadcast %82 : vector<8x1xf32> to vector<8x8xf32>
    %84 = arith.subf %80, %83 : vector<8x8xf32>
    %85 = math.exp %84 : vector<8x8xf32>
    %cst_45 = arith.constant dense<0.000000e+00> : vector<8xf32>
    %86 = vector.multi_reduction <add>, %85, %cst_45 [1] : vector<8x8xf32> to vector<8xf32>
    %87 = vector.shape_cast %86 : vector<8xf32> to vector<8x1xf32>
    %88 = tpu.reciprocal %87 : vector<8x1xf32> -> vector<8x1xf32>
    %89 = vector.broadcast %88 : vector<8x1xf32> to vector<8x8xf32>
    %90 = arith.mulf %85, %89 : vector<8x8xf32>
    %cst_46 = arith.constant dense<0.000000e+00> : vector<8x8xf32>
    %91 = tpu.matmul %90, %78, %cst_46 {dimension_numbers = #tpu.dot_dimension_numbers<[1], [0], [0], [1], [0, 0, 1, 1], [], []>} : vector<8x8xf32>, vector<8x8xf32>, vector<8x8xf32> -> vector<8x8xf32>
    %c24 = arith.constant 24 : index
    %c0_47 = arith.constant 0 : index
    %92 = vector.load %arg6[%c24, %c0_47] : memref<32x32xf32, #tpu.memory_space<vmem>>, vector<8x32xf32>
    %cst_48 = arith.constant dense<0.000000e+00> : vector<8x32xf32>
    %93 = tpu.matmul %91, %92, %cst_48 {dimension_numbers = #tpu.dot_dimension_numbers<[1], [0], [0], [1], [0, 0, 1, 1], [], []>} : vector<8x8xf32>, vector<8x32xf32>, vector<8x32xf32> -> vector<8x32xf32>
    %c0_49 = arith.constant 0 : index
    %c0_50 = arith.constant 0 : index
    %94 = vector.load %arg10[%c0_49, %c0_50] : memref<8x32xf32, #tpu.memory_space<vmem>>, vector<8x32xf32>
    %95 = arith.addf %94, %93 : vector<8x32xf32>
    %c0_51 = arith.constant 0 : index
    %c0_52 = arith.constant 0 : index
    %96 = vector.load %arg10[%c0_51, %c0_52] : memref<8x32xf32, #tpu.memory_space<vmem>>, vector<8x32xf32>
    tpu.vector_store %arg10[%c0_51, %c0_52], %95 {strides = array<i32>} : memref<8x32xf32, #tpu.memory_space<vmem>>, vector<8x32xf32>,
    %c0_53 = arith.constant 0 : index
    %c0_54 = arith.constant 0 : index
    %97 = vector.load %arg10[%c0_53, %c0_54] : memref<8x32xf32, #tpu.memory_space<vmem>>, vector<8x32xf32>
    %c0_55 = arith.constant 0 : index
    %c0_56 = arith.constant 0 : index
    %98 = vector.load %arg7[%c0_55, %c0_56] : memref<1x32xf32, #tpu.memory_space<vmem>>, vector<1x32xf32>
    %99 = vector.broadcast %98 : vector<1x32xf32> to vector<8x32xf32>
    %100 = arith.addf %97, %99 : vector<8x32xf32>
    %c0_57 = arith.constant 0 : index
    %c0_58 = arith.constant 0 : index
    %c0_59 = arith.constant 0 : index
    %101 = vector.load %arg8[%c0_57, %c0_58, %c0_59] : memref<1x8x32xf32, #tpu.memory_space<vmem>>, vector<1x8x32xf32>
    %102 = vector.shape_cast %101 : vector<1x8x32xf32> to vector<8x32xf32>
    %103 = vector.shape_cast %100 : vector<8x32xf32> to vector<1x8x32xf32>
    tpu.vector_store %arg8[%c0_57, %c0_58, %c0_59], %103 {strides = array<i32>} : memref<1x8x32xf32, #tpu.memory_space<vmem>>, vector<1x8x32xf32>,
    return
  }
  func.func @transform_0(%arg0: i32, %arg1: i32) -> (i32, i32, i32) {
    %c0_i32 = arith.constant 0 : i32
    %c0_i32_0 = arith.constant 0 : i32
    %c0_i32_1 = arith.constant 0 : i32
    return %arg0, %c0_i32, %c0_i32_0 : i32, i32, i32
  }
  func.func @transform_1(%arg0: i32, %arg1: i32) -> (i32, i32, i32) {
    %c0_i32 = arith.constant 0 : i32
    %c0_i32_0 = arith.constant 0 : i32
    return %arg0, %arg1, %c0_i32 : i32, i32, i32
  }
  func.func @transform_2(%arg0: i32, %arg1: i32) -> (i32, i32) {
    %c0_i32 = arith.constant 0 : i32
    %c0_i32_0 = arith.constant 0 : i32
    %c0_i32_1 = arith.constant 0 : i32
    return %c0_i32, %c0_i32_0 : i32, i32
  }
  func.func @transform_3(%arg0: i32, %arg1: i32) -> (i32, i32) {
    %c0_i32 = arith.constant 0 : i32
    %c0_i32_0 = arith.constant 0 : i32
    %c0_i32_1 = arith.constant 0 : i32
    return %c0_i32, %c0_i32_0 : i32, i32
  }
  func.func @transform_4(%arg0: i32, %arg1: i32) -> (i32, i32) {
    %c0_i32 = arith.constant 0 : i32
    %c0_i32_0 = arith.constant 0 : i32
    %c0_i32_1 = arith.constant 0 : i32
    return %c0_i32, %c0_i32_0 : i32, i32
  }
  func.func @transform_5(%arg0: i32, %arg1: i32) -> (i32, i32) {
    %c0_i32 = arith.constant 0 : i32
    %c0_i32_0 = arith.constant 0 : i32
    %c0_i32_1 = arith.constant 0 : i32
    return %c0_i32, %c0_i32_0 : i32, i32
  }
  func.func @transform_6(%arg0: i32, %arg1: i32) -> (i32, i32, i32) {
    %c0_i32 = arith.constant 0 : i32
    %c0_i32_0 = arith.constant 0 : i32
    return %arg0, %arg1, %c0_i32 : i32, i32, i32
  }
}

</mosaic_0001>

<bundles_post_ra>
// kernel: tpu_custom_call.1
= control target key start
LH: loop header
LB: loop body
LE: loop exit
PB: predicated region body
PF: predicated region fallthrough
CT: control target
= control target key end

     0   :  { %s1628_s0 = inlined_call_operand.hbm [shape: f32[2,8,32], index: 0, kind: input, shape index: {}]   ;;  %s1629_s1 = inlined_call_operand.hbm [shape: s8[2,8,8], index: 1, kind: input, shape index: {}]   ;;  %s1630_s2 = inlined_call_operand.hbm [shape: f32[32,96], index: 2, kind: input, shape index: {}]   ;;  %s1631_s3 = inlined_call_operand.vmem [shape: f32[1,96], index: 3, kind: input, shape index: {}]   ;;  %s1632_s4 = inlined_call_operand.hbm [shape: f32[32,32], index: 4, kind: input, shape index: {}]   ;;  %s1633_s5 = inlined_call_operand.vmem [shape: f32[1,32], index: 5, kind: input, shape index: {}]   ;;  %s1634_s6 = inlined_call_operand.hbm [shape: f32[2,8,32], index: 6, kind: output, shape index: {}]  }
   0x1   :  { %1639 = sst [smem:[#allocation23_spill]] %s1630_s2 }
   0x2   :  { %1640 = sst [smem:[#allocation24_spill]] %s1632_s4 }
   0x3   :  { %1641 = sst [smem:[#allocation25_spill]] %s1633_s5 }
   0x4   :  { %11 = vsyncpa [#allocation5], 0 }
   0x5   :  { %13 = vsyncpa [#allocation5 + $0x1], 0 }
   0x6   :  { %14 = vsyncpa [#allocation8], 0 }
   0x7   :  { %16 = vsyncpa [#allocation8 + $0x1], 0 }
   0x8   :  { %17 = vsyncpa [#allocation11], 0 }
   0x9   :  { %18 = vsyncpa [#allocation6], 0 }
   0xa   :  { %20 = vsyncpa [#allocation6 + $0x1], 0  ;;  %s1404_s21 = smov 0   ;;  %s1406_s22 = smov 0  }
   0xb   :  { %s1408_s23 = smov 0   ;;  %s1410_s24 = smov 0  }
   0xc   :  { %s1412_s25 = smov 0   ;;  %s1414_s26 = smov 0  }
   0xd LB: > { %1642 = sst [smem:[#allocation18_spill]] %s1331_s21  ;;  %s1435_s27 = sadd.s32 4294967295, %s1351_s26   ;;  %s1351_s26 = sphi %s1414_s26, %s26_s26   ;;  %s1347_s25 = sphi %s1412_s25, %s1663_s25   ;;  %s1343_s24 = sphi %s1410_s24, %s1662_s24   ;;  %s1339_s23 = sphi %s1408_s23, %s1658_s23   ;;  %s1335_s22 = sphi %s1406_s22, %s1661_s22   ;;  %s1331_s21 = sphi %s1404_s21, %s1660_s21  }
   0xe   : > { %1643 = sst [smem:[#allocation19_spill]] %s1339_s23  ;;  %p982_p0 = scmp.ge.s32.totalorder %s1351_s26, 1 }
   0xf   : > { %p59_p1 = scmp.eq.s32.totalorder %s1435_s27, 0  ;;  %p209_p2 = scmp.lt.s32.totalorder %s1351_s26, 3 }
  0x10   : > { %s1644_s2 = sld [smem:[#allocation23_spill]]  ;;  %s1353_s8 = smov [#allocation9]  }
  0x11   : > { %p1443_p3 = pnand %p982_p0, %p209_p2  ;;  %s222_s9 = sshll.u32 %s1353_s8, 4  ;;  %s223_s9 = int_to_ptr.vmem [resolvable:$true] %s222_s9 }
  0x12   : > { %p985_p6 = scmp.ge.s32.totalorder %s1351_s26, 2  ;;  %s1646_s4 = sld [smem:[#allocation24_spill]] }
  0x13   : > { %p1031_p4 = pneg %p1443_p3  ;;  %s1354_s13 = smov 128  }
  0x14   : > { %s1355_s14 = smov 8   ;;  %s1356_s15 = smov [#allocation10]  }
  0x15   : > { %p1032_p5 = pnand %p1031_p4, %p59_p1  ;;  %s239_s16 = sshll.u32 %s1356_s15, 4  ;;  %s240_s16 = int_to_ptr.vmem [resolvable:$true] %s239_s16 }
  0x16   : > { %s220_s30 = sshll.u32 %s1644_s2, 4  ;;  %s981_s17 = sadd.s32 4294967294, %s1351_s26   ;;  %s221_s30 = int_to_ptr.hbm [resolvable:$true] %s220_s30 }
  0x17   : > { %1034 = dma.hbm_to_vmem [thread:$0]  (!%p1032_p5), %s221_s30, 512, %s223_s9, [#allocation8], %s1354_s13, %s1354_s13, %s1355_s14  }
  0x18   : > { %s237_s12 = sshll.u32 %s1646_s4, 4  ;;  %s38_s18 = sadd.s32 1, %s1347_s25  ;;  %s238_s12 = int_to_ptr.hbm [resolvable:$true] %s237_s12 }
  0x19   : > { %1037 = dma.hbm_to_vmem [thread:$0]  (!%p1032_p5), %s238_s12, 512, %s240_s16, [#allocation11], %s1354_s13, %s1354_s13, %s1355_s14  }
  0x1a   : > { %p40_p7 = scmp.ge.s32.totalorder %s38_s18, 2  ;;  %s45_s19 = sadd.s32 1, %s1339_s23 }
  0x1b   : > { %p52_p8 = scmp.ne.s32.totalorder %s1339_s23, %s1335_s22  ;;  %p53_p9 = scmp.eq.s32.totalorder %s1351_s26, 0 }
  0x1c   : > { %s1665_s18 = smov (%p40_p7, %s38_s18), 0  ;;  %p58_p11 = scmp.ne.s32.totalorder %s1335_s22, %s1331_s21 }
  0x1d   : > { %1647 = sst [smem:[#allocation20_spill]] %s1665_s18  ;;  %p1463_p10 = por %p53_p9, %p52_p8 }
  0x1e   : > { %s42_s28 = ssub.s32 %s1347_s25, %s1665_s18  ;;  %p196_p12 = scmp.eq.s32.totalorder %s1435_s27, 1 }
  0x1f   : > { %p43_p13 = scmp.eq.s32.totalorder %s42_s28, 0  ;;  %p1474_p0 = por %p59_p1, %p58_p11 }
  0x20   : > { %p1478_p2 = por %p196_p12, %p52_p8  ;;  %p202_p4 = scmp.eq.s32.totalorder %s981_s17, 1 }
  0x21   : > { %s1483_s8 = scalar_select %p43_p13, %s1339_s23, %s45_s19  }
  0x22   : > { %p1485_p5 = por %p202_p4, %p58_p11  ;;  %p1051_p7 = scmp.lt.s32.totalorder %s1351_s26, 2 }
  0x23   : > { %1651 = sst [smem:[#allocation21_spill]] %s1483_s8  ;;  %s256_s10 = sand.u32 1, %s1339_s23  }
  0x24   : > { %s1652_s9 = scalar_select %p1485_p5, 1, 0 }
  0x25   : > { %s987_s11 = sshll.u32 %s1347_s25, 3  ;;  %s986_s12 = sshll.u32 %s256_s10, 3 }
  0x26   : > { %1653 = sst [smem:[#allocation22_spill]] %s1652_s9  ;;  %s264_s15 = scalar_lea.hbm %s1628_s0, %s987_s11 }
  0x27   : > { %s266_s16 = sshll.u32 %s264_s15, 4  ;;  %s260_s28 = scalar_lea.vmem [#allocation4], %s986_s12  ;;  %s267_s16 = int_to_ptr.hbm [resolvable:$true] %s266_s16 }
  0x28   : > { %s268_s2 = sshll.u32 %s260_s28, 4  ;;  %p1039_p8 = pnand %p1051_p7, %p1463_p10  ;;  %s269_s2 = int_to_ptr.vmem [resolvable:$true] %s268_s2 }
  0x29   : > { %s275_s17 = sand.u32 1, %s1351_s26   ;;  %s988_s19 = sshll.u32 %s256_s10, 1 }
  0x2a   : > { %s257_s4 = scalar_lea.sflag [#allocation5], %s256_s10  ;;  %s989_s18 = sshll.u32 %s1347_s25, 1 }
  0x2b   : > { %1041 = dma.hbm_to_vmem [thread:$0]  (!%p1039_p8), %s267_s16, 128, %s269_s2, %s257_s4  }
  0x2c   : > { %s279_s8 = scalar_lea.vmem [#allocation7], %s988_s19  ;;  %s284_s5 = scalar_lea.hbm %s1629_s1, %s989_s18 }
  0x2d   : > { %s288_s23 = sshll.u32 %s279_s8, 4  ;;  %s286_s11 = sshll.u32 %s284_s5, 4  ;;  %s289_s23 = int_to_ptr.vmem [resolvable:$true] %s288_s23  ;;  %s287_s11 = int_to_ptr.hbm [resolvable:$true] %s286_s11 }
  0x2e   : > { %s276_s12 = scalar_lea.sflag [#allocation8], %s275_s17  ;;  %297 = sbr.rel (%p1443_p3) target bundleno = 1930 (0x78a), region = 44 }
  0x2f   : > { %1044 = dma.hbm_to_vmem [thread:$0]  (!%p1039_p8), %s287_s11, 32, %s289_s23, %s276_s12  }
  0x30   : > { %s1505_s20 = sand.u32 (!%p1443_p3), 1, %s1335_s22  }
  0x31   : > { %s991_s2 = sshll.u32 (!%p1443_p3), %s1505_s20, 3  ;;  %s300_s4 = scalar_lea.sflag (!%p1443_p3), [#allocation5], %s1505_s20 }
  0x32   : > { %s303_s21 = scalar_lea.vmem (!%p1443_p3), [#allocation4], %s991_s2 }
  0x33   : > { %1310 = dma.done.wait (%p1474_p0), %s300_s4, 128  }
  0x34   : > { %1312 = vsyncadd (%p1474_p0), %s300_s4, 4294967168  ;;  %s309_s5 = sand.u32 1, %s1435_s27   ;;  %s992_s23 = sshll.u32 %s1505_s20, 1 }
  0x35   : > { %s310_s7 = scalar_lea.sflag [#allocation8], %s309_s5  ;;  %s1517_s18 = scalar_lea.vmem [#allocation7], %s992_s23 }
  0x36   : > { %1314 = dma.done.wait (%p1474_p0), %s310_s7, 32  }
  0x37   : > { %1316 = vsyncadd (%p1474_p0), %s310_s7, 4294967264 }
  0x38   : > { %1318 = dma.done.wait (%p59_p1), [#allocation8], 512  }
  0x39   : > { %1320 = vsyncadd (%p59_p1), [#allocation8], 4294966784 }
  0x3a   : > { %1322 = dma.done.wait (%p59_p1), [#allocation11], 512  }
  0x3b   : > { %1324 = vsyncadd (%p59_p1), [#allocation11], 4294966784  ;;  %v366_v0 = vld [vmem:[#allocation9 + $0x18] sm:$0xff]  ;;  %v365_v1 = vld [vmem:[#allocation9 + $0x10] sm:$0xff]  ;;  %vm371_vm0 = vcmask 261120   ;;  %vm395_vm1 = vcmask 785408  }
  0x3c   : > { %387 = vmatpush.msra.mxu0 %v366_v0  ;;  %v364_v2 = vld [vmem:[#allocation9 + $0x8] sm:$0xff]  ;;  %v363_v3 = vld [vmem:[#allocation9] sm:$0xff]  ;;  %v1119_v5 = vld [vmem:[%s1631_s3] ss:$0 sm:$0xff]  ;;  %s1357_s27 = smov 88   ;;  %s1358_s9 = smov 96  }
  0x3d   : > { %v362_v4 = vld [vmem:[%s303_s21] sm:$0xff]  ;;  %s1359_s10 = smov 120   ;;  %vm409_vm2 = vcmask 64512   ;;  %v397_v10 = vld [vmem:[%s1517_s18] sm:$0x3]  ;;  %v1360_v13 = vmov 0.0  }
  0x3e   : > { %388 = vmatpush.msra.mxu0 %v365_v1  ;;  %v398_v11 = vunpack.c.0.s8 %v397_v10  ;;  %s1361_s13 = smov 56   ;;  %s1362_s14 = smov 112   ;;  %v485_v18 = vld [vmem:[#allocation10] sm:$0xff]  ;;  %v591_v52 = vld [vmem:[#allocation10 + $0x8] sm:$0xff] }
  0x3f   : > { %s1363_s15 = smov 104   ;;  %504 = vmatpush.msra.mxu3 %v485_v18  ;;  %s1364_s16 = smov 64  }
  0x40   : > { %389 = vmatpush.msra.mxu0 %v364_v2  ;;  %v399_v12 = vcvt.s32.f32 %v398_v11  ;;  %s1365_s28 = smov 80   ;;  %s1366_s17 = smov 72  }
  0x41   : > { %s1367_s19 = smov 48   ;;  %s1368_s11 = smov 40  }
  0x42   : > { %390 = vmatpush.msra.mxu0 %v363_v3  ;;  %vm400_vm3 = vcmp.eq.f32.partialorder %v399_v12, 0.0  ;;  %s1014_s12 = sshll.u32 %s1343_s24, 3  ;;  %s1654_s18 = sld [smem:[#allocation25_spill]] }
  0x43   : > { %996 = vmatmul.msk.f32.vlgmr.msra.gmra.mxu0 %vm371_vm0, %v362_v4  ;;  %v1544_v14 = vsel %vm400_vm3, -1e+09, %v1360_v13  ;;  %s851_s5 = scalar_lea.hbm %s1634_s6, %s1014_s12  ;;  %s357_s29 = scalar_lea.vmem [#allocation12], %s991_s2 }
  0x44   : > { %s853_s8 = sshll.u32 %s357_s29, 4  ;;  %s840_s24 = scalar_lea.sflag [#allocation6], %s1505_s20  ;;  %s854_s8 = int_to_ptr.vmem [resolvable:$true] %s853_s8 }
  0x45   : > { %s1277_s2 = scalar_lea.hbm %s1634_s6, 16 }
  0xc0   : > { %v392_v6 = vpop.f32.mrf.mxu0 }
  0xc1   : > { %v393_v7 = vadd.f32 %v1119_v5, %v392_v6 }
  0xc3   : > { %396 = vst.msk [vmem:[#allocation2] sm:$0xff] %vm395_vm1, %v393_v7 }
  0xca   : > { %v1535_v8 = vld [vmem:[#allocation2] sm:$0xff] }
  0xcb   : > { %515 = vrot.lane.b32.xlu2 %v1535_v8, %s1357_s27  ;;  %407 = vrot.lane.b32.xlu0 %v1535_v8, %s1358_s9  ;;  %s855_s27 = sshll.u32 %s851_s5, 4  ;;  %s856_s27 = int_to_ptr.hbm [resolvable:$true] %s855_s27 }
  0xcc   : > { %s1271_s9 = sshra.s32 %s856_s27, 4  ;;  %s1272_s9 = int_to_ptr.hbm [resolvable:$true] %s1271_s9 }
  0xcd   : > { %p1278_p10 = scmp.lt.s32.totalorder %s1272_s9, %s1634_s6 }
  0xd3   : > { %512 = vrot.lane.b32.xlu2 %v1535_v8, %s1359_s10  ;;  %s1273_s10 = scalar_lea.hbm %s1272_s9, 8 }
  0xd4   : > { %p1274_p1 = scmp.ne.s32.totalorder %s1272_s9, %s1273_s10  ;;  %p1279_p11 = scmp.lt.s32.totalorder %s1277_s2, %s1273_s10 }
  0xd6   : > { %p1275_p3 = pnand %p1274_p1, %p1478_p2  ;;  %p1280_p12 = por %p1279_p11, %p1278_p10 }
  0xd8   : > { %p1276_p9 = pneg %p1275_p3 }
  0xda   : > { %p1281_p13 = pnand %p1280_p12, %p1276_p9 }
 0x125   : > { %v516_v36 = vpop.permute.xlu2 %515 }
 0x12d   : > { %v513_v39 = vpop.permute.xlu2 %512 }
 0x13d   : > { %v408_v9 = vpop.permute.xlu0 %407 }
 0x13e   : > { %997 = vmatpush.xpose.msk.msra.mxu1 %vm409_vm2, %v408_v9 }
 0x141   : > { %998 = vmatmul.msk.f32.vlgmr.msra.gmra.mxu1 %vm409_vm2, %v1535_v8 }
 0x142   : > { %610 = vmatpush.msrb.mxu1 %v591_v52 }
 0x1be   : > { %v432_v15 = vpop.f32.mrf.mxu1 }
 0x1bf   : > { %v433_v16 = vadd.f32 %v432_v15, %v1544_v14 }
 0x1c1   : > { %v435_v17 = vsel %vm409_vm2, %v433_v16, -inf }
 0x1c2   : > { %436 = vmax.xlane.f32.xlu0 %v435_v17 }
 0x1d6   : > { %565 = vrot.lane.b32.xlu0 %v1535_v8, %s1361_s13 }
 0x1de   : > { %619 = vrot.lane.b32.xlu0 %v1535_v8, %s1362_s14 }
 0x1e6   : > { %726 = vrot.lane.b32.xlu0 %v1535_v8, %s1363_s15 }
 0x235   : > { %v437_v19 = vpop.xlane.xlu0 %436 }
 0x236   : > { %v438_v20 = vsub.f32 %v433_v16, %v437_v19 }
 0x238   : > { %v439_v21 = vmul.f32 1.442695, %v438_v20 }
 0x23a   : > { %1121 = vpow2.f32 %v439_v21 }
 0x240   : > { %v1122_v22 = vpop.eup %1121 }
 0x241   : > { %v441_v23 = vsel %vm409_vm2, %v1122_v22, 0.0 }
 0x242   : > { %442 = vadd.xlane.f32.xlu1 %v441_v23 }
 0x248   : > { %v566_v24 = vpop.permute.xlu0 %565 }
 0x249   : > { %586 = vmatpush.msrb.mxu3 %v566_v24 }
 0x250   : > { %v620_v50 = vpop.permute.xlu0 %619 }
 0x258   : > { %v727_v12 = vpop.permute.xlu0 %726 }
 0x25b   : > { %459 = vrot.lane.b32.xlu1 %v1535_v8, %s1364_s16 }
 0x2b5   : > { %v443_v25 = vpop.xlane.xlu1 %442 }
 0x2b6   : > { %1123 = vrcp.f32 %v443_v25  ;;  %v455_v31 = vand.u32 2147483648, %v443_v25  ;;  %vm449_vm5 = vweird.f32 %v443_v25  ;;  %v453_v32 = vand.u32 2147483647, %v443_v25 }
 0x2b8   : > { %v456_v34 = vor.u32 1.1754944e-38, %v455_v31  ;;  %vm454_vm7 = vcmp.eq.f32.partialorder %v453_v32, 8.507059e+37 }
 0x2bc   : > { %v1124_v26 = vpop.eup %1123 }
 0x2bd   : > { %v445_v27 = vmul.f32 %v1124_v26, %v443_v25  ;;  %vm450_vm4 = vweird.f32 %v1124_v26 }
 0x2be   : > { %vm451_vm6 = vmor %vm449_vm5, %vm450_vm4 }
 0x2bf   : > { %v446_v28 = vsub.f32 1.0, %v445_v27 }
 0x2c1   : > { %v447_v29 = vmul.f32 %v1124_v26, %v446_v28 }
 0x2c3   : > { %v448_v30 = vadd.f32 %v1124_v26, %v447_v29 }
 0x2c5   : > { %v452_v33 = vsel %vm451_vm6, %v1124_v26, %v448_v30 }
 0x2c6   : > { %v457_v35 = vsel %vm454_vm7, %v456_v34, %v452_v33 }
 0x2c7   : > { %v458_v38 = vmul.f32 %v1122_v22, %v457_v35 }
 0x2cd   : > { %v460_v37 = vpop.permute.xlu1 %459 }
 0x2ce   : > { %480 = vmatpush.msra.mxu2 %v460_v37  ;;  %v698_v37 = vld [vmem:[#allocation10 + $0x10] sm:$0xff] }
 0x2cf   : > { %999 = vmatmul.msk.f32.vlgmr.msra.gmra.mxu2 %vm409_vm2, %v458_v38  ;;  %v805_v38 = vld [vmem:[#allocation10 + $0x18] sm:$0xff] }
 0x2d0   : > { %1001 = vmatpush.xpose.msk.msrb.mxu2 %vm409_vm2, %v516_v36 }
 0x2d7   : > { %1002 = vmatmul.msk.f32.vlgmr.msrb.gmra.mxu2 %vm409_vm2, %v513_v39 }
 0x352   : > { %v482_v40 = vpop.f32.mrf.mxu2 }
 0x353   : > { %1000 = vmatmul.msk.f32.vlgmr.msra.gmra.mxu3 %vm409_vm2, %v482_v40 }
 0x354   : > { %717 = vmatpush.msra.mxu3 %v698_v37 }
 0x35a   : > { %v538_v41 = vpop.f32.mrf.mxu2 }
 0x35b   : > { %v539_v42 = vadd.f32 %v538_v41, %v1544_v14 }
 0x35d   : > { %v541_v43 = vsel %vm409_vm2, %v539_v42, -inf }
 0x35e   : > { %542 = vmax.xlane.f32.xlu2 %v541_v43 }
 0x376   : > { %622 = vrot.lane.b32.xlu2 %v1535_v8, %s1365_s28 }
 0x3d1   : > { %v543_v44 = vpop.xlane.xlu2 %542 }
 0x3d2   : > { %v544_v45 = vsub.f32 %v539_v42, %v543_v44 }
 0x3d4   : > { %v545_v46 = vmul.f32 1.442695, %v544_v45 }
 0x3d6   : > { %1125 = vpow2.f32 %v545_v46  ;;  %v506_v47 = vpop.f32.mrf.mxu3 }
 0x3d7   : > { %510 = vst.msk [vmem:[#allocation3] sm:$0xff] %vm371_vm0, %v506_v47 }
 0x3d9   : > { %v623_v48 = vpop.permute.xlu2 %622 }
 0x3da   : > { %1005 = vmatpush.xpose.msk.msrb.mxu0 %vm409_vm2, %v623_v48 }
 0x3dc   : > { %v1126_v49 = vpop.eup %1125 }
 0x3dd   : > { %1006 = vmatmul.msk.f32.vlgmr.msrb.gmra.mxu0 %vm409_vm2, %v620_v50  ;;  %v547_v51 = vsel %vm409_vm2, %v1126_v49, 0.0 }
 0x3de   : > { %548 = vadd.xlane.f32.xlu1 %v547_v51  ;;  %v615_v15 = vld [vmem:[#allocation3] sm:$0xff] }
 0x3f7   : > { %729 = vrot.lane.b32.xlu1 %v1535_v8, %s1366_s17 }
 0x451   : > { %v549_v53 = vpop.xlane.xlu1 %548 }
 0x452   : > { %1127 = vrcp.f32 %v549_v53  ;;  %v561_v59 = vand.u32 2147483648, %v549_v53  ;;  %v559_v61 = vand.u32 2147483647, %v549_v53  ;;  %vm555_vm9 = vweird.f32 %v549_v53 }
 0x454   : > { %v562_v0 = vor.u32 1.1754944e-38, %v561_v59  ;;  %vm560_vm11 = vcmp.eq.f32.partialorder %v559_v61, 8.507059e+37  ;;  %v1120_v59 = vld [vmem:[%s1654_s18] ss:$0 sm:$0xff] }
 0x458   : > { %v1128_v54 = vpop.eup %1127 }
 0x459   : > { %v551_v55 = vmul.f32 %v1128_v54, %v549_v53  ;;  %vm556_vm8 = vweird.f32 %v1128_v54 }
 0x45a   : > { %v645_v56 = vpop.f32.mrf.mxu0  ;;  %vm557_vm10 = vmor %vm555_vm9, %vm556_vm8 }
 0x45b   : > { %v552_v57 = vsub.f32 1.0, %v551_v55  ;;  %v646_v58 = vadd.f32 %v645_v56, %v1544_v14 }
 0x45d   : > { %v553_v60 = vmul.f32 %v1128_v54, %v552_v57  ;;  %v648_v62 = vsel %vm409_vm2, %v646_v58, -inf }
 0x45e   : > { %649 = vmax.xlane.f32.xlu2 %v648_v62 }
 0x45f   : > { %v554_v63 = vadd.f32 %v1128_v54, %v553_v60 }
 0x461   : > { %v558_v1 = vsel %vm557_vm10, %v1128_v54, %v554_v63 }
 0x462   : > { %v563_v2 = vsel %vm560_vm11, %v562_v0, %v558_v1 }
 0x463   : > { %v564_v3 = vmul.f32 %v1126_v49, %v563_v2 }
 0x465   : > { %1003 = vmatmul.msk.f32.vlgmr.msrb.gmra.mxu3 %vm409_vm2, %v564_v3 }
 0x469   : > { %v730_v4 = vpop.permute.xlu1 %729 }
 0x46a   : > { %1009 = vmatpush.xpose.msk.msra.mxu1 %vm409_vm2, %v730_v4 }
 0x4d1   : > { %v650_v5 = vpop.xlane.xlu2 %649 }
 0x4d2   : > { %v651_v6 = vsub.f32 %v646_v58, %v650_v5 }
 0x4d4   : > { %v652_v7 = vmul.f32 1.442695, %v651_v6 }
 0x4d6   : > { %1129 = vpow2.f32 %v652_v7 }
 0x4dc   : > { %v1130_v9 = vpop.eup %1129 }
 0x4dd   : > { %v654_v10 = vsel %vm409_vm2, %v1130_v9, 0.0 }
 0x4de   : > { %655 = vadd.xlane.f32.xlu1 %v654_v10 }
 0x4e8   : > { %v588_v11 = vpop.f32.mrf.mxu3 }
 0x4e9   : > { %1004 = vmatmul.msk.f32.vlgmr.msrb.gmra.mxu1 %vm409_vm2, %v588_v11 }
 0x4f1   : > { %1010 = vmatmul.msk.f32.vlgmr.msra.gmra.mxu1 %vm409_vm2, %v727_v12 }
 0x551   : > { %v656_v20 = vpop.xlane.xlu1 %655 }
 0x552   : > { %1131 = vrcp.f32 %v656_v20  ;;  %v668_v29 = vand.u32 2147483648, %v656_v20  ;;  %vm662_vm13 = vweird.f32 %v656_v20  ;;  %v666_v30 = vand.u32 2147483647, %v656_v20 }
 0x554   : > { %v669_v33 = vor.u32 1.1754944e-38, %v668_v29  ;;  %vm667_vm15 = vcmp.eq.f32.partialorder %v666_v30, 8.507059e+37 }
 0x558   : > { %v1132_v21 = vpop.eup %1131 }
 0x559   : > { %v658_v22 = vmul.f32 %v1132_v21, %v656_v20  ;;  %vm663_vm12 = vweird.f32 %v1132_v21 }
 0x55a   : > { %vm664_vm14 = vmor %vm662_vm13, %vm663_vm12 }
 0x55b   : > { %v659_v24 = vsub.f32 1.0, %v658_v22 }
 0x55d   : > { %v660_v27 = vmul.f32 %v1132_v21, %v659_v24 }
 0x55f   : > { %v661_v28 = vadd.f32 %v1132_v21, %v660_v27 }
 0x561   : > { %v665_v32 = vsel %vm664_vm14, %v1132_v21, %v661_v28 }
 0x562   : > { %v670_v34 = vsel %vm667_vm15, %v669_v33, %v665_v32 }
 0x563   : > { %v671_v35 = vmul.f32 %v1130_v9, %v670_v34 }
 0x566   : > { %v612_v13 = vpop.f32.mrf.mxu1 }
 0x567   : > { %v616_v16 = vadd.f32 %v615_v15, %v612_v13 }
 0x569   : > { %617 = vst.msk [vmem:[#allocation3] sm:$0xff] %vm371_vm0, %v616_v16 }
 0x56e   : > { %v752_v17 = vpop.f32.mrf.mxu1 }
 0x56f   : > { %v753_v18 = vadd.f32 %v752_v17, %v1544_v14 }
 0x570   : > { %v722_v54 = vld [vmem:[#allocation3] sm:$0xff] }
 0x571   : > { %v755_v19 = vsel %vm409_vm2, %v753_v18, -inf }
 0x572   : > { %756 = vmax.xlane.f32.xlu0 %v755_v19 }
 0x586   : > { %672 = vrot.lane.b32.xlu0 %v1535_v8, %s1367_s19 }
 0x5e5   : > { %v757_v23 = vpop.xlane.xlu0 %756 }
 0x5e6   : > { %v758_v25 = vsub.f32 %v753_v18, %v757_v23 }
 0x5e8   : > { %v759_v26 = vmul.f32 1.442695, %v758_v25 }
 0x5ea   : > { %1133 = vpow2.f32 %v759_v26 }
 0x5f0   : > { %v1134_v14 = vpop.eup %1133 }
 0x5f1   : > { %v761_v31 = vsel %vm409_vm2, %v1134_v14, 0.0 }
 0x5f2   : > { %762 = vadd.xlane.f32.xlu2 %v761_v31 }
 0x5f8   : > { %v673_v36 = vpop.permute.xlu0 %672 }
 0x5f9   : > { %693 = vmatpush.msra.mxu2 %v673_v36 }
 0x5fa   : > { %1007 = vmatmul.msk.f32.vlgmr.msra.gmra.mxu2 %vm409_vm2, %v671_v35 }
 0x5fb   : > { %824 = vmatpush.msrb.mxu2 %v805_v38 }
 0x60a   : > { %779 = vrot.lane.b32.xlu2 %v1535_v8, %s1368_s11 }
 0x665   : > { %v763_v39 = vpop.xlane.xlu2 %762 }
 0x666   : > { %1135 = vrcp.f32 %v763_v39  ;;  %v775_v44 = vand.u32 2147483648, %v763_v39  ;;  %v773_v46 = vand.u32 2147483647, %v763_v39  ;;  %vm769_vm3 = vweird.f32 %v763_v39 }
 0x668   : > { %v776_v48 = vor.u32 1.1754944e-38, %v775_v44  ;;  %vm774_vm5 = vcmp.eq.f32.partialorder %v773_v46, 8.507059e+37 }
 0x66c   : > { %v1136_v40 = vpop.eup %1135 }
 0x66d   : > { %v765_v41 = vmul.f32 %v1136_v40, %v763_v39  ;;  %v780_v42 = vpop.permute.xlu2 %779  ;;  %vm770_vm1 = vweird.f32 %v1136_v40 }
 0x66e   : > { %800 = vmatpush.msra.mxu0 %v780_v42  ;;  %vm771_vm4 = vmor %vm769_vm3, %vm770_vm1 }
 0x66f   : > { %v766_v43 = vsub.f32 1.0, %v765_v41 }
 0x671   : > { %v767_v45 = vmul.f32 %v1136_v40, %v766_v43 }
 0x673   : > { %v768_v47 = vadd.f32 %v1136_v40, %v767_v45 }
 0x675   : > { %v772_v8 = vsel %vm771_vm4, %v1136_v40, %v768_v47 }
 0x676   : > { %v777_v49 = vsel %vm774_vm5, %v776_v48, %v772_v8 }
 0x677   : > { %v778_v50 = vmul.f32 %v1134_v14, %v777_v49 }
 0x679   : > { %1011 = vmatmul.msk.f32.vlgmr.msra.gmra.mxu0 %vm409_vm2, %v778_v50 }
 0x67d   : > { %v695_v51 = vpop.f32.mrf.mxu2 }
 0x67e   : > { %1008 = vmatmul.msk.f32.vlgmr.msra.gmra.mxu3 %vm409_vm2, %v695_v51 }
 0x6f6   : > { %v802_v52 = vpop.f32.mrf.mxu0 }
 0x6f7   : > { %1012 = vmatmul.msk.f32.vlgmr.msrb.gmra.mxu2 %vm409_vm2, %v802_v52 }
 0x701   : > { %v719_v53 = vpop.f32.mrf.mxu3 }
 0x702   : > { %v723_v55 = vadd.f32 %v722_v54, %v719_v53 }
 0x704   : > { %724 = vst.msk [vmem:[#allocation3] sm:$0xff] %vm371_vm0, %v723_v55 }
 0x70b   : > { %v829_v57 = vld [vmem:[#allocation3] sm:$0xff] }
 0x77a   : > { %v826_v56 = vpop.f32.mrf.mxu2 }
 0x77b   : > { %v830_v58 = vadd.f32 %v829_v57, %v826_v56 }
 0x77d   : > { %831 = vst.msk [vmem:[#allocation3] sm:$0xff] %vm371_vm0, %v830_v58 }
 0x784   : > { %v832_v60 = vld [vmem:[#allocation3] sm:$0xff] }
 0x785   : > { %v837_v61 = vadd.f32 %v1120_v59, %v832_v60 }
 0x787   : > { %838 = vst.msk [vmem:[%s357_s29] sm:$0xff] %vm371_vm0, %v837_v61 }
 0x788   : > { %1284 = shalt.err (!%p1281_p13)
}
 0x789   : > { %1029 = dma.vmem_to_hbm [thread:$0]  (%p1478_p2), %s854_s8, 128, %s856_s27, %s840_s24  }
 0x78a PF: > { %s1655_s20 = sld [smem:[#allocation18_spill]]  ;;  %p1046_p0 = pnand %p985_p6, %p1485_p5 }
 0x78c   : > { %p1047_p4 = pneg %p1046_p0 }
 0x790   : > { %s867_s17 = sand.u32 1, %s1655_s20  }
 0x791   : > { %s868_s19 = scalar_lea.sflag [#allocation6], %s867_s17 }
 0x792   : > { %1326 = dma.done.wait (%p1047_p4), %s868_s19, 128  }
 0x793   : > { %1328 = vsyncadd (%p1047_p4), %s868_s19, 4294967168  ;;  %s26_s26 = sadd.s32 1, %s1351_s26   ;;  %s1657_s11 = sld [smem:[#allocation19_spill]] }
 0x794   : > { %p23_p7 = scmp.ge.s32.totalorder %s26_s26, 4   ;;  %s1658_s23 = sld [smem:[#allocation21_spill]] }
 0x795   : > { %s1659_s30 = sld [smem:[#allocation20_spill]]  ;;  %s1660_s21 = smov %s1335_s22 }
 0x796   : > { %s1662_s24 = smov %s1347_s25 }
 0x797   :  { %25 = sbr.rel (!%p23_p7) target bundleno = 13 (0xd), region = 115 }
 0x799   : > { %s1661_s22 = smov %s1657_s11 }
 0x79b   : > { %s1663_s25 = smov %s1659_s30 }
 0x79c   :  { %874 = vsyncpa [#allocation5], 1 }
 0x79d   :  { %876 = vsyncpa [#allocation5 + $0x1], 1 }
 0x79e   :  { %877 = vsyncpa [#allocation8], 1 }
 0x79f   :  { %879 = vsyncpa [#allocation8 + $0x1], 1 }
 0x7a0   :  { %880 = vsyncpa [#allocation11], 1 }
 0x7a1   :  { %881 = vsyncpa [#allocation6], 1 }
 0x7a2   :  { %883 = vsyncpa [#allocation6 + $0x1], 1 }

// kernel: tpu_custom_call.1
= control target key start
LH: loop header
LB: loop body
LE: loop exit
PB: predicated region body
PF: predicated region fallthrough
CT: control target
= control target key end

     0   :  { %s1628_s0 = inlined_call_operand.hbm [shape: f32[2,8,32], index: 0, kind: input, shape index: {}]   ;;  %s1629_s1 = inlined_call_operand.hbm [shape: s8[2,8,8], index: 1, kind: input, shape index: {}]   ;;  %s1630_s2 = inlined_call_operand.hbm [shape: f32[32,96], index: 2, kind: input, shape index: {}]   ;;  %s1631_s3 = inlined_call_operand.vmem [shape: f32[1,96], index: 3, kind: input, shape index: {}]   ;;  %s1632_s4 = inlined_call_operand.hbm [shape: f32[32,32], index: 4, kind: input, shape index: {}]   ;;  %s1633_s5 = inlined_call_operand.vmem [shape: f32[1,32], index: 5, kind: input, shape index: {}]   ;;  %s1634_s6 = inlined_call_operand.hbm [shape: f32[2,8,32], index: 6, kind: output, shape index: {}]  }
   0x1   :  { %1639 = sst [smem:[#allocation23_spill]] %s1630_s2 }
   0x2   :  { %1640 = sst [smem:[#allocation24_spill]] %s1632_s4 }
   0x3   :  { %1641 = sst [smem:[#allocation25_spill]] %s1633_s5 }
   0x4   :  { %11 = vsyncpa [#allocation5], 0 }
   0x5   :  { %13 = vsyncpa [#allocation5 + $0x1], 0 }
   0x6   :  { %14 = vsyncpa [#allocation8], 0 }
   0x7   :  { %16 = vsyncpa [#allocation8 + $0x1], 0 }
   0x8   :  { %17 = vsyncpa [#allocation11], 0 }
   0x9   :  { %18 = vsyncpa [#allocation6], 0 }
   0xa   :  { %20 = vsyncpa [#allocation6 + $0x1], 0  ;;  %s1404_s21 = smov 0   ;;  %s1406_s22 = smov 0  }
   0xb   :  { %s1408_s23 = smov 0   ;;  %s1410_s24 = smov 0  }
   0xc   :  { %s1412_s25 = smov 0   ;;  %s1414_s26 = smov 0  }
   0xd LB: > { %1642 = sst [smem:[#allocation18_spill]] %s1331_s21  ;;  %s1435_s27 = sadd.s32 4294967295, %s1351_s26   ;;  %s1351_s26 = sphi %s1414_s26, %s26_s26   ;;  %s1347_s25 = sphi %s1412_s25, %s1663_s25   ;;  %s1343_s24 = sphi %s1410_s24, %s1662_s24   ;;  %s1339_s23 = sphi %s1408_s23, %s1658_s23   ;;  %s1335_s22 = sphi %s1406_s22, %s1661_s22   ;;  %s1331_s21 = sphi %s1404_s21, %s1660_s21  }
   0xe   : > { %1643 = sst [smem:[#allocation19_spill]] %s1339_s23  ;;  %p982_p0 = scmp.ge.s32.totalorder %s1351_s26, 1 }
   0xf   : > { %p59_p1 = scmp.eq.s32.totalorder %s1435_s27, 0  ;;  %p209_p2 = scmp.lt.s32.totalorder %s1351_s26, 3 }
  0x10   : > { %s1644_s2 = sld [smem:[#allocation23_spill]]  ;;  %s1353_s8 = smov [#allocation9]  }
  0x11   : > { %p1443_p3 = pnand %p982_p0, %p209_p2  ;;  %s222_s9 = sshll.u32 %s1353_s8, 4  ;;  %s223_s9 = int_to_ptr.vmem [resolvable:$true] %s222_s9 }
  0x12   : > { %p985_p6 = scmp.ge.s32.totalorder %s1351_s26, 2  ;;  %s1646_s4 = sld [smem:[#allocation24_spill]] }
  0x13   : > { %p1031_p4 = pneg %p1443_p3  ;;  %s1354_s13 = smov 128  }
  0x14   : > { %s1355_s14 = smov 8   ;;  %s1356_s15 = smov [#allocation10]  }
  0x15   : > { %p1032_p5 = pnand %p1031_p4, %p59_p1  ;;  %s239_s16 = sshll.u32 %s1356_s15, 4  ;;  %s240_s16 = int_to_ptr.vmem [resolvable:$true] %s239_s16 }
  0x16   : > { %s220_s30 = sshll.u32 %s1644_s2, 4  ;;  %s981_s17 = sadd.s32 4294967294, %s1351_s26   ;;  %s221_s30 = int_to_ptr.hbm [resolvable:$true] %s220_s30 }
  0x17   : > { %1034 = dma.hbm_to_vmem [thread:$0]  (!%p1032_p5), %s221_s30, 512, %s223_s9, [#allocation8], %s1354_s13, %s1354_s13, %s1355_s14  }
  0x18   : > { %s237_s12 = sshll.u32 %s1646_s4, 4  ;;  %s38_s18 = sadd.s32 1, %s1347_s25  ;;  %s238_s12 = int_to_ptr.hbm [resolvable:$true] %s237_s12 }
  0x19   : > { %1037 = dma.hbm_to_vmem [thread:$0]  (!%p1032_p5), %s238_s12, 512, %s240_s16, [#allocation11], %s1354_s13, %s1354_s13, %s1355_s14  }
  0x1a   : > { %p40_p7 = scmp.ge.s32.totalorder %s38_s18, 2  ;;  %s45_s19 = sadd.s32 1, %s1339_s23 }
  0x1b   : > { %p52_p8 = scmp.ne.s32.totalorder %s1339_s23, %s1335_s22  ;;  %p53_p9 = scmp.eq.s32.totalorder %s1351_s26, 0 }
  0x1c   : > { %s1665_s18 = smov (%p40_p7, %s38_s18), 0  ;;  %p58_p11 = scmp.ne.s32.totalorder %s1335_s22, %s1331_s21 }
  0x1d   : > { %1647 = sst [smem:[#allocation20_spill]] %s1665_s18  ;;  %p1463_p10 = por %p53_p9, %p52_p8 }
  0x1e   : > { %s42_s28 = ssub.s32 %s1347_s25, %s1665_s18  ;;  %p196_p12 = scmp.eq.s32.totalorder %s1435_s27, 1 }
  0x1f   : > { %p43_p13 = scmp.eq.s32.totalorder %s42_s28, 0  ;;  %p1474_p0 = por %p59_p1, %p58_p11 }
  0x20   : > { %p1478_p2 = por %p196_p12, %p52_p8  ;;  %p202_p4 = scmp.eq.s32.totalorder %s981_s17, 1 }
  0x21   : > { %s1483_s8 = scalar_select %p43_p13, %s1339_s23, %s45_s19  }
  0x22   : > { %p1485_p5 = por %p202_p4, %p58_p11  ;;  %p1051_p7 = scmp.lt.s32.totalorder %s1351_s26, 2 }
  0x23   : > { %1651 = sst [smem:[#allocation21_spill]] %s1483_s8  ;;  %s256_s10 = sand.u32 1, %s1339_s23  }
  0x24   : > { %s1652_s9 = scalar_select %p1485_p5, 1, 0 }
  0x25   : > { %s987_s11 = sshll.u32 %s1347_s25, 3  ;;  %s986_s12 = sshll.u32 %s256_s10, 3 }
  0x26   : > { %1653 = sst [smem:[#allocation22_spill]] %s1652_s9  ;;  %s264_s15 = scalar_lea.hbm %s1628_s0, %s987_s11 }
  0x27   : > { %s266_s16 = sshll.u32 %s264_s15, 4  ;;  %s260_s28 = scalar_lea.vmem [#allocation4], %s986_s12  ;;  %s267_s16 = int_to_ptr.hbm [resolvable:$true] %s266_s16 }
  0x28   : > { %s268_s2 = sshll.u32 %s260_s28, 4  ;;  %p1039_p8 = pnand %p1051_p7, %p1463_p10  ;;  %s269_s2 = int_to_ptr.vmem [resolvable:$true] %s268_s2 }
  0x29   : > { %s275_s17 = sand.u32 1, %s1351_s26   ;;  %s988_s19 = sshll.u32 %s256_s10, 1 }
  0x2a   : > { %s257_s4 = scalar_lea.sflag [#allocation5], %s256_s10  ;;  %s989_s18 = sshll.u32 %s1347_s25, 1 }
  0x2b   : > { %1041 = dma.hbm_to_vmem [thread:$0]  (!%p1039_p8), %s267_s16, 128, %s269_s2, %s257_s4  }
  0x2c   : > { %s279_s8 = scalar_lea.vmem [#allocation7], %s988_s19  ;;  %s284_s5 = scalar_lea.hbm %s1629_s1, %s989_s18 }
  0x2d   : > { %s288_s23 = sshll.u32 %s279_s8, 4  ;;  %s286_s11 = sshll.u32 %s284_s5, 4  ;;  %s289_s23 = int_to_ptr.vmem [resolvable:$true] %s288_s23  ;;  %s287_s11 = int_to_ptr.hbm [resolvable:$true] %s286_s11 }
  0x2e   : > { %s276_s12 = scalar_lea.sflag [#allocation8], %s275_s17  ;;  %297 = sbr.rel (%p1443_p3) target bundleno = 1930 (0x78a), region = 44 }
  0x2f   : > { %1044 = dma.hbm_to_vmem [thread:$0]  (!%p1039_p8), %s287_s11, 32, %s289_s23, %s276_s12  }
  0x30   : > { %s1505_s20 = sand.u32 (!%p1443_p3), 1, %s1335_s22  }
  0x31   : > { %s991_s2 = sshll.u32 (!%p1443_p3), %s1505_s20, 3  ;;  %s300_s4 = scalar_lea.sflag (!%p1443_p3), [#allocation5], %s1505_s20 }
  0x32   : > { %s303_s21 = scalar_lea.vmem (!%p1443_p3), [#allocation4], %s991_s2 }
  0x33   : > { %1310 = dma.done.wait (%p1474_p0), %s300_s4, 128  }
  0x34   : > { %1312 = vsyncadd (%p1474_p0), %s300_s4, 4294967168  ;;  %s309_s5 = sand.u32 1, %s1435_s27   ;;  %s992_s23 = sshll.u32 %s1505_s20, 1 }
  0x35   : > { %s310_s7 = scalar_lea.sflag [#allocation8], %s309_s5  ;;  %s1517_s18 = scalar_lea.vmem [#allocation7], %s992_s23 }
  0x36   : > { %1314 = dma.done.wait (%p1474_p0), %s310_s7, 32  }
  0x37   : > { %1316 = vsyncadd (%p1474_p0), %s310_s7, 4294967264 }
  0x38   : > { %1318 = dma.done.wait (%p59_p1), [#allocation8], 512  }
  0x39   : > { %1320 = vsyncadd (%p59_p1), [#allocation8], 4294966784 }
  0x3a   : > { %1322 = dma.done.wait (%p59_p1), [#allocation11], 512  }
  0x3b   : > { %1324 = vsyncadd (%p59_p1), [#allocation11], 4294966784  ;;  %v366_v0 = vld [vmem:[#allocation9 + $0x18] sm:$0xff]  ;;  %v365_v1 = vld [vmem:[#allocation9 + $0x10] sm:$0xff]  ;;  %vm371_vm0 = vcmask 261120   ;;  %vm395_vm1 = vcmask 785408  }
  0x3c   : > { %387 = vmatpush.msra.mxu0 %v366_v0  ;;  %v364_v2 = vld [vmem:[#allocation9 + $0x8] sm:$0xff]  ;;  %v363_v3 = vld [vmem:[#allocation9] sm:$0xff]  ;;  %v1119_v5 = vld [vmem:[%s1631_s3] ss:$0 sm:$0xff]  ;;  %s1357_s27 = smov 88   ;;  %s1358_s9 = smov 96  }
  0x3d   : > { %v362_v4 = vld [vmem:[%s303_s21] sm:$0xff]  ;;  %s1359_s10 = smov 120   ;;  %vm409_vm2 = vcmask 64512   ;;  %v397_v10 = vld [vmem:[%s1517_s18] sm:$0x3]  ;;  %v1360_v13 = vmov 0.0  }
  0x3e   : > { %388 = vmatpush.msra.mxu0 %v365_v1  ;;  %v398_v11 = vunpack.c.0.s8 %v397_v10  ;;  %s1361_s13 = smov 56   ;;  %s1362_s14 = smov 112   ;;  %v485_v18 = vld [vmem:[#allocation10] sm:$0xff]  ;;  %v591_v52 = vld [vmem:[#allocation10 + $0x8] sm:$0xff] }
  0x3f   : > { %s1363_s15 = smov 104   ;;  %504 = vmatpush.msra.mxu3 %v485_v18  ;;  %s1364_s16 = smov 64  }
  0x40   : > { %389 = vmatpush.msra.mxu0 %v364_v2  ;;  %v399_v12 = vcvt.s32.f32 %v398_v11  ;;  %s1365_s28 = smov 80   ;;  %s1366_s17 = smov 72  }
  0x41   : > { %s1367_s19 = smov 48   ;;  %s1368_s11 = smov 40  }
  0x42   : > { %390 = vmatpush.msra.mxu0 %v363_v3  ;;  %vm400_vm3 = vcmp.eq.f32.partialorder %v399_v12, 0.0  ;;  %s1014_s12 = sshll.u32 %s1343_s24, 3  ;;  %s1654_s18 = sld [smem:[#allocation25_spill]] }
  0x43   : > { %996 = vmatmul.msk.f32.vlgmr.msra.gmra.mxu0 %vm371_vm0, %v362_v4  ;;  %v1544_v14 = vsel %vm400_vm3, -1e+09, %v1360_v13  ;;  %s851_s5 = scalar_lea.hbm %s1634_s6, %s1014_s12  ;;  %s357_s29 = scalar_lea.vmem [#allocation12], %s991_s2 }
  0x44   : > { %s853_s8 = sshll.u32 %s357_s29, 4  ;;  %s840_s24 = scalar_lea.sflag [#allocation6], %s1505_s20  ;;  %s854_s8 = int_to_ptr.vmem [resolvable:$true] %s853_s8 }
  0x45   : > { %s1277_s2 = scalar_lea.hbm %s1634_s6, 16 }
  0xc0   : > { %v392_v6 = vpop.f32.mrf.mxu0 }
  0xc1   : > { %v393_v7 = vadd.f32 %v1119_v5, %v392_v6 }
  0xc3   : > { %396 = vst.msk [vmem:[#allocation2] sm:$0xff] %vm395_vm1, %v393_v7 }
  0xca   : > { %v1535_v8 = vld [vmem:[#allocation2] sm:$0xff] }
  0xcb   : > { %515 = vrot.lane.b32.xlu2 %v1535_v8, %s1357_s27  ;;  %407 = vrot.lane.b32.xlu0 %v1535_v8, %s1358_s9  ;;  %s855_s27 = sshll.u32 %s851_s5, 4  ;;  %s856_s27 = int_to_ptr.hbm [resolvable:$true] %s855_s27 }
  0xcc   : > { %s1271_s9 = sshra.s32 %s856_s27, 4  ;;  %s1272_s9 = int_to_ptr.hbm [resolvable:$true] %s1271_s9 }
  0xcd   : > { %p1278_p10 = scmp.lt.s32.totalorder %s1272_s9, %s1634_s6 }
  0xd3   : > { %512 = vrot.lane.b32.xlu2 %v1535_v8, %s1359_s10  ;;  %s1273_s10 = scalar_lea.hbm %s1272_s9, 8 }
  0xd4   : > { %p1274_p1 = scmp.ne.s32.totalorder %s1272_s9, %s1273_s10  ;;  %p1279_p11 = scmp.lt.s32.totalorder %s1277_s2, %s1273_s10 }
  0xd6   : > { %p1275_p3 = pnand %p1274_p1, %p1478_p2  ;;  %p1280_p12 = por %p1279_p11, %p1278_p10 }
  0xd8   : > { %p1276_p9 = pneg %p1275_p3 }
  0xda   : > { %p1281_p13 = pnand %p1280_p12, %p1276_p9 }
 0x125   : > { %v516_v36 = vpop.permute.xlu2 %515 }
 0x12d   : > { %v513_v39 = vpop.permute.xlu2 %512 }
 0x13d   : > { %v408_v9 = vpop.permute.xlu0 %407 }
 0x13e   : > { %997 = vmatpush.xpose.msk.msra.mxu1 %vm409_vm2, %v408_v9 }
 0x141   : > { %998 = vmatmul.msk.f32.vlgmr.msra.gmra.mxu1 %vm409_vm2, %v1535_v8 }
 0x142   : > { %610 = vmatpush.msrb.mxu1 %v591_v52 }
 0x1be   : > { %v432_v15 = vpop.f32.mrf.mxu1 }
 0x1bf   : > { %v433_v16 = vadd.f32 %v432_v15, %v1544_v14 }
 0x1c1   : > { %v435_v17 = vsel %vm409_vm2, %v433_v16, -inf }
 0x1c2   : > { %436 = vmax.xlane.f32.xlu0 %v435_v17 }
 0x1d6   : > { %565 = vrot.lane.b32.xlu0 %v1535_v8, %s1361_s13 }
 0x1de   : > { %619 = vrot.lane.b32.xlu0 %v1535_v8, %s1362_s14 }
 0x1e6   : > { %726 = vrot.lane.b32.xlu0 %v1535_v8, %s1363_s15 }
 0x235   : > { %v437_v19 = vpop.xlane.xlu0 %436 }
 0x236   : > { %v438_v20 = vsub.f32 %v433_v16, %v437_v19 }
 0x238   : > { %v439_v21 = vmul.f32 1.442695, %v438_v20 }
 0x23a   : > { %1121 = vpow2.f32 %v439_v21 }
 0x240   : > { %v1122_v22 = vpop.eup %1121 }
 0x241   : > { %v441_v23 = vsel %vm409_vm2, %v1122_v22, 0.0 }
 0x242   : > { %442 = vadd.xlane.f32.xlu1 %v441_v23 }
 0x248   : > { %v566_v24 = vpop.permute.xlu0 %565 }
 0x249   : > { %586 = vmatpush.msrb.mxu3 %v566_v24 }
 0x250   : > { %v620_v50 = vpop.permute.xlu0 %619 }
 0x258   : > { %v727_v12 = vpop.permute.xlu0 %726 }
 0x25b   : > { %459 = vrot.lane.b32.xlu1 %v1535_v8, %s1364_s16 }
 0x2b5   : > { %v443_v25 = vpop.xlane.xlu1 %442 }
 0x2b6   : > { %1123 = vrcp.f32 %v443_v25  ;;  %v455_v31 = vand.u32 2147483648, %v443_v25  ;;  %vm449_vm5 = vweird.f32 %v443_v25  ;;  %v453_v32 = vand.u32 2147483647, %v443_v25 }
 0x2b8   : > { %v456_v34 = vor.u32 1.1754944e-38, %v455_v31  ;;  %vm454_vm7 = vcmp.eq.f32.partialorder %v453_v32, 8.507059e+37 }
 0x2bc   : > { %v1124_v26 = vpop.eup %1123 }
 0x2bd   : > { %v445_v27 = vmul.f32 %v1124_v26, %v443_v25  ;;  %vm450_vm4 = vweird.f32 %v1124_v26 }
 0x2be   : > { %vm451_vm6 = vmor %vm449_vm5, %vm450_vm4 }
 0x2bf   : > { %v446_v28 = vsub.f32 1.0, %v445_v27 }
 0x2c1   : > { %v447_v29 = vmul.f32 %v1124_v26, %v446_v28 }
 0x2c3   : > { %v448_v30 = vadd.f32 %v1124_v26, %v447_v29 }
 0x2c5   : > { %v452_v33 = vsel %vm451_vm6, %v1124_v26, %v448_v30 }
 0x2c6   : > { %v457_v35 = vsel %vm454_vm7, %v456_v34, %v452_v33 }
 0x2c7   : > { %v458_v38 = vmul.f32 %v1122_v22, %v457_v35 }
 0x2cd   : > { %v460_v37 = vpop.permute.xlu1 %459 }
 0x2ce   : > { %480 = vmatpush.msra.mxu2 %v460_v37  ;;  %v698_v37 = vld [vmem:[#allocation10 + $0x10] sm:$0xff] }
 0x2cf   : > { %999 = vmatmul.msk.f32.vlgmr.msra.gmra.mxu2 %vm409_vm2, %v458_v38  ;;  %v805_v38 = vld [vmem:[#allocation10 + $0x18] sm:$0xff] }
 0x2d0   : > { %1001 = vmatpush.xpose.msk.msrb.mxu2 %vm409_vm2, %v516_v36 }
 0x2d7   : > { %1002 = vmatmul.msk.f32.vlgmr.msrb.gmra.mxu2 %vm409_vm2, %v513_v39 }
 0x352   : > { %v482_v40 = vpop.f32.mrf.mxu2 }
 0x353   : > { %1000 = vmatmul.msk.f32.vlgmr.msra.gmra.mxu3 %vm409_vm2, %v482_v40 }
 0x354   : > { %717 = vmatpush.msra.mxu3 %v698_v37 }
 0x35a   : > { %v538_v41 = vpop.f32.mrf.mxu2 }
 0x35b   : > { %v539_v42 = vadd.f32 %v538_v41, %v1544_v14 }
 0x35d   : > { %v541_v43 = vsel %vm409_vm2, %v539_v42, -inf }
 0x35e   : > { %542 = vmax.xlane.f32.xlu2 %v541_v43 }
 0x376   : > { %622 = vrot.lane.b32.xlu2 %v1535_v8, %s1365_s28 }
 0x3d1   : > { %v543_v44 = vpop.xlane.xlu2 %542 }
 0x3d2   : > { %v544_v45 = vsub.f32 %v539_v42, %v543_v44 }
 0x3d4   : > { %v545_v46 = vmul.f32 1.442695, %v544_v45 }
 0x3d6   : > { %1125 = vpow2.f32 %v545_v46  ;;  %v506_v47 = vpop.f32.mrf.mxu3 }
 0x3d7   : > { %510 = vst.msk [vmem:[#allocation3] sm:$0xff] %vm371_vm0, %v506_v47 }
 0x3d9   : > { %v623_v48 = vpop.permute.xlu2 %622 }
 0x3da   : > { %1005 = vmatpush.xpose.msk.msrb.mxu0 %vm409_vm2, %v623_v48 }
 0x3dc   : > { %v1126_v49 = vpop.eup %1125 }
 0x3dd   : > { %1006 = vmatmul.msk.f32.vlgmr.msrb.gmra.mxu0 %vm409_vm2, %v620_v50  ;;  %v547_v51 = vsel %vm409_vm2, %v1126_v49, 0.0 }
 0x3de   : > { %548 = vadd.xlane.f32.xlu1 %v547_v51  ;;  %v615_v15 = vld [vmem:[#allocation3] sm:$0xff] }
 0x3f7   : > { %729 = vrot.lane.b32.xlu1 %v1535_v8, %s1366_s17 }
 0x451   : > { %v549_v53 = vpop.xlane.xlu1 %548 }
 0x452   : > { %1127 = vrcp.f32 %v549_v53  ;;  %v561_v59 = vand.u32 2147483648, %v549_v53  ;;  %v559_v61 = vand.u32 2147483647, %v549_v53  ;;  %vm555_vm9 = vweird.f32 %v549_v53 }
 0x454   : > { %v562_v0 = vor.u32 1.1754944e-38, %v561_v59  ;;  %vm560_vm11 = vcmp.eq.f32.partialorder %v559_v61, 8.507059e+37  ;;  %v1120_v59 = vld [vmem:[%s1654_s18] ss:$0 sm:$0xff] }
 0x458   : > { %v1128_v54 = vpop.eup %1127 }
 0x459   : > { %v551_v55 = vmul.f32 %v1128_v54, %v549_v53  ;;  %vm556_vm8 = vweird.f32 %v1128_v54 }
 0x45a   : > { %v645_v56 = vpop.f32.mrf.mxu0  ;;  %vm557_vm10 = vmor %vm555_vm9, %vm556_vm8 }
 0x45b   : > { %v552_v57 = vsub.f32 1.0, %v551_v55  ;;  %v646_v58 = vadd.f32 %v645_v56, %v1544_v14 }
 0x45d   : > { %v553_v60 = vmul.f32 %v1128_v54, %v552_v57  ;;  %v648_v62 = vsel %vm409_vm2, %v646_v58, -inf }
 0x45e   : > { %649 = vmax.xlane.f32.xlu2 %v648_v62 }
 0x45f   : > { %v554_v63 = vadd.f32 %v1128_v54, %v553_v60 }
 0x461   : > { %v558_v1 = vsel %vm557_vm10, %v1128_v54, %v554_v63 }
 0x462   : > { %v563_v2 = vsel %vm560_vm11, %v562_v0, %v558_v1 }
 0x463   : > { %v564_v3 = vmul.f32 %v1126_v49, %v563_v2 }
 0x465   : > { %1003 = vmatmul.msk.f32.vlgmr.msrb.gmra.mxu3 %vm409_vm2, %v564_v3 }
 0x469   : > { %v730_v4 = vpop.permute.xlu1 %729 }
 0x46a   : > { %1009 = vmatpush.xpose.msk.msra.mxu1 %vm409_vm2, %v730_v4 }
 0x4d1   : > { %v650_v5 = vpop.xlane.xlu2 %649 }
 0x4d2   : > { %v651_v6 = vsub.f32 %v646_v58, %v650_v5 }
 0x4d4   : > { %v652_v7 = vmul.f32 1.442695, %v651_v6 }
 0x4d6   : > { %1129 = vpow2.f32 %v652_v7 }
 0x4dc   : > { %v1130_v9 = vpop.eup %1129 }
 0x4dd   : > { %v654_v10 = vsel %vm409_vm2, %v1130_v9, 0.0 }
 0x4de   : > { %655 = vadd.xlane.f32.xlu1 %v654_v10 }
 0x4e8   : > { %v588_v11 = vpop.f32.mrf.mxu3 }
 0x4e9   : > { %1004 = vmatmul.msk.f32.vlgmr.msrb.gmra.mxu1 %vm409_vm2, %v588_v11 }
 0x4f1   : > { %1010 = vmatmul.msk.f32.vlgmr.msra.gmra.mxu1 %vm409_vm2, %v727_v12 }
 0x551   : > { %v656_v20 = vpop.xlane.xlu1 %655 }
 0x552   : > { %1131 = vrcp.f32 %v656_v20  ;;  %v668_v29 = vand.u32 2147483648, %v656_v20  ;;  %vm662_vm13 = vweird.f32 %v656_v20  ;;  %v666_v30 = vand.u32 2147483647, %v656_v20 }
 0x554   : > { %v669_v33 = vor.u32 1.1754944e-38, %v668_v29  ;;  %vm667_vm15 = vcmp.eq.f32.partialorder %v666_v30, 8.507059e+37 }
 0x558   : > { %v1132_v21 = vpop.eup %1131 }
 0x559   : > { %v658_v22 = vmul.f32 %v1132_v21, %v656_v20  ;;  %vm663_vm12 = vweird.f32 %v1132_v21 }
 0x55a   : > { %vm664_vm14 = vmor %vm662_vm13, %vm663_vm12 }
 0x55b   : > { %v659_v24 = vsub.f32 1.0, %v658_v22 }
 0x55d   : > { %v660_v27 = vmul.f32 %v1132_v21, %v659_v24 }
 0x55f   : > { %v661_v28 = vadd.f32 %v1132_v21, %v660_v27 }
 0x561   : > { %v665_v32 = vsel %vm664_vm14, %v1132_v21, %v661_v28 }
 0x562   : > { %v670_v34 = vsel %vm667_vm15, %v669_v33, %v665_v32 }
 0x563   : > { %v671_v35 = vmul.f32 %v1130_v9, %v670_v34 }
 0x566   : > { %v612_v13 = vpop.f32.mrf.mxu1 }
 0x567   : > { %v616_v16 = vadd.f32 %v615_v15, %v612_v13 }
 0x569   : > { %617 = vst.msk [vmem:[#allocation3] sm:$0xff] %vm371_vm0, %v616_v16 }
 0x56e   : > { %v752_v17 = vpop.f32.mrf.mxu1 }
 0x56f   : > { %v753_v18 = vadd.f32 %v752_v17, %v1544_v14 }
 0x570   : > { %v722_v54 = vld [vmem:[#allocation3] sm:$0xff] }
 0x571   : > { %v755_v19 = vsel %vm409_vm2, %v753_v18, -inf }
 0x572   : > { %756 = vmax.xlane.f32.xlu0 %v755_v19 }
 0x586   : > { %672 = vrot.lane.b32.xlu0 %v1535_v8, %s1367_s19 }
 0x5e5   : > { %v757_v23 = vpop.xlane.xlu0 %756 }
 0x5e6   : > { %v758_v25 = vsub.f32 %v753_v18, %v757_v23 }
 0x5e8   : > { %v759_v26 = vmul.f32 1.442695, %v758_v25 }
 0x5ea   : > { %1133 = vpow2.f32 %v759_v26 }
 0x5f0   : > { %v1134_v14 = vpop.eup %1133 }
 0x5f1   : > { %v761_v31 = vsel %vm409_vm2, %v1134_v14, 0.0 }
 0x5f2   : > { %762 = vadd.xlane.f32.xlu2 %v761_v31 }
 0x5f8   : > { %v673_v36 = vpop.permute.xlu0 %672 }
 0x5f9   : > { %693 = vmatpush.msra.mxu2 %v673_v36 }
 0x5fa   : > { %1007 = vmatmul.msk.f32.vlgmr.msra.gmra.mxu2 %vm409_vm2, %v671_v35 }
 0x5fb   : > { %824 = vmatpush.msrb.mxu2 %v805_v38 }
 0x60a   : > { %779 = vrot.lane.b32.xlu2 %v1535_v8, %s1368_s11 }
 0x665   : > { %v763_v39 = vpop.xlane.xlu2 %762 }
 0x666   : > { %1135 = vrcp.f32 %v763_v39  ;;  %v775_v44 = vand.u32 2147483648, %v763_v39  ;;  %v773_v46 = vand.u32 2147483647, %v763_v39  ;;  %vm769_vm3 = vweird.f32 %v763_v39 }
 0x668   : > { %v776_v48 = vor.u32 1.1754944e-38, %v775_v44  ;;  %vm774_vm5 = vcmp.eq.f32.partialorder %v773_v46, 8.507059e+37 }
 0x66c   : > { %v1136_v40 = vpop.eup %1135 }
 0x66d   : > { %v765_v41 = vmul.f32 %v1136_v40, %v763_v39  ;;  %v780_v42 = vpop.permute.xlu2 %779  ;;  %vm770_vm1 = vweird.f32 %v1136_v40 }
 0x66e   : > { %800 = vmatpush.msra.mxu0 %v780_v42  ;;  %vm771_vm4 = vmor %vm769_vm3, %vm770_vm1 }
 0x66f   : > { %v766_v43 = vsub.f32 1.0, %v765_v41 }
 0x671   : > { %v767_v45 = vmul.f32 %v1136_v40, %v766_v43 }
 0x673   : > { %v768_v47 = vadd.f32 %v1136_v40, %v767_v45 }
 0x675   : > { %v772_v8 = vsel %vm771_vm4, %v1136_v40, %v768_v47 }
 0x676   : > { %v777_v49 = vsel %vm774_vm5, %v776_v48, %v772_v8 }
 0x677   : > { %v778_v50 = vmul.f32 %v1134_v14, %v777_v49 }
 0x679   : > { %1011 = vmatmul.msk.f32.vlgmr.msra.gmra.mxu0 %vm409_vm2, %v778_v50 }
 0x67d   : > { %v695_v51 = vpop.f32.mrf.mxu2 }
 0x67e   : > { %1008 = vmatmul.msk.f32.vlgmr.msra.gmra.mxu3 %vm409_vm2, %v695_v51 }
 0x6f6   : > { %v802_v52 = vpop.f32.mrf.mxu0 }
 0x6f7   : > { %1012 = vmatmul.msk.f32.vlgmr.msrb.gmra.mxu2 %vm409_vm2, %v802_v52 }
 0x701   : > { %v719_v53 = vpop.f32.mrf.mxu3 }
 0x702   : > { %v723_v55 = vadd.f32 %v722_v54, %v719_v53 }
 0x704   : > { %724 = vst.msk [vmem:[#allocation3] sm:$0xff] %vm371_vm0, %v723_v55 }
 0x70b   : > { %v829_v57 = vld [vmem:[#allocation3] sm:$0xff] }
 0x77a   : > { %v826_v56 = vpop.f32.mrf.mxu2 }
 0x77b   : > { %v830_v58 = vadd.f32 %v829_v57, %v826_v56 }
 0x77d   : > { %831 = vst.msk [vmem:[#allocation3] sm:$0xff] %vm371_vm0, %v830_v58 }
 0x784   : > { %v832_v60 = vld [vmem:[#allocation3] sm:$0xff] }
 0x785   : > { %v837_v61 = vadd.f32 %v1120_v59, %v832_v60 }
 0x787   : > { %838 = vst.msk [vmem:[%s357_s29] sm:$0xff] %vm371_vm0, %v837_v61 }
 0x788   : > { %1284 = shalt.err (!%p1281_p13)
}
 0x789   : > { %1029 = dma.vmem_to_hbm [thread:$0]  (%p1478_p2), %s854_s8, 128, %s856_s27, %s840_s24  }
 0x78a PF: > { %s1655_s20 = sld [smem:[#allocation18_spill]]  ;;  %p1046_p0 = pnand %p985_p6, %p1485_p5 }
 0x78c   : > { %p1047_p4 = pneg %p1046_p0 }
 0x790   : > { %s867_s17 = sand.u32 1, %s1655_s20  }
 0x791   : > { %s868_s19 = scalar_lea.sflag [#allocation6], %s867_s17 }
 0x792   : > { %1326 = dma.done.wait (%p1047_p4), %s868_s19, 128  }
 0x793   : > { %1328 = vsyncadd (%p1047_p4), %s868_s19, 4294967168  ;;  %s26_s26 = sadd.s32 1, %s1351_s26   ;;  %s1657_s11 = sld [smem:[#allocation19_spill]] }
 0x794   : > { %p23_p7 = scmp.ge.s32.totalorder %s26_s26, 4   ;;  %s1658_s23 = sld [smem:[#allocation21_spill]] }
 0x795   : > { %s1659_s30 = sld [smem:[#allocation20_spill]]  ;;  %s1660_s21 = smov %s1335_s22 }
 0x796   : > { %s1662_s24 = smov %s1347_s25 }
 0x797   :  { %25 = sbr.rel (!%p23_p7) target bundleno = 13 (0xd), region = 115 }
 0x799   : > { %s1661_s22 = smov %s1657_s11 }
 0x79b   : > { %s1663_s25 = smov %s1659_s30 }
 0x79c   :  { %874 = vsyncpa [#allocation5], 1 }
 0x79d   :  { %876 = vsyncpa [#allocation5 + $0x1], 1 }
 0x79e   :  { %877 = vsyncpa [#allocation8], 1 }
 0x79f   :  { %879 = vsyncpa [#allocation8 + $0x1], 1 }
 0x7a0   :  { %880 = vsyncpa [#allocation11], 1 }
 0x7a1   :  { %881 = vsyncpa [#allocation6], 1 }
 0x7a2   :  { %883 = vsyncpa [#allocation6 + $0x1], 1 }

</bundles_post_ra>
